<compile_context>
chip_gen: v5e
topology: v5e:2x2
jax: 0.10.0
libtpu: 0.0.40
codegen_flags: <defaults>
</compile_context>

<pallas_src>
import functools

import jax
import jax.numpy as jnp
from jax import lax
from jax.experimental import pallas as pl
from jax.experimental.pallas import tpu as pltpu

EPS = 1e-5


def feature_fuse_kernel(x_ref, w_ref, mask_ref, gamma_ref, beta_ref, o_ref,
                        xpad_ref, rhs_ref, *, H, W, Wp):
    """Fused conv1x1 + conv3x3 + dilated conv3x3 + BatchNorm2d (training-mode stats).

    x_ref:    (N, Cin, H*W)        input, NCHW with spatial flattened (lane-dense)
    w_ref:    (Cout, 19*Cin)       packed weights [conv11 | conv33 taps | conv33_di taps]
    mask_ref: (1, N*H*Wp)          1.0 on valid (non padded-width) output columns
    gamma_ref,beta_ref: (Cout, 1)  BatchNorm affine parameters
    o_ref:    (Cout, N*H*Wp)       un-compacted, lane-dense output (wrapper drops pad cols)
    xpad_ref: (N, Cin, Hp*Wp)      VMEM scratch: zero-padded, flattened input
    rhs_ref:  (19*Cin, N*H*Wp)     VMEM scratch: im2col matrix
    """
    N, Cin, _ = x_ref.shape
    L = H * Wp                       # flat (padded-width) positions per image
    cnt = float(N * H * W)           # number of *valid* positions for the BN statistics

    # ---- 1) in-kernel zero padding (2 left/top, 2 right, 3 bottom), flat row-major ----
    xpad_ref[...] = jnp.zeros(xpad_ref.shape, xpad_ref.dtype)
    for i in range(H):
        dst = (2 + i) * Wp + 2
        xpad_ref[:, :, dst:dst + W] = x_ref[:, :, i * W:(i + 1) * W]

    # ---- 2) assemble the im2col RHS once: 19 tap row-blocks of Cin rows, N*L columns ----
    # Tap order must match the host-side weight packing:
    #   [conv1x1 | conv3x3 taps (ky,kx) row-major | dilated conv3x3 taps (ky,kx) row-major]
    taps = ([(2, 2)]
            + [(1 + ky, 1 + kx) for ky in range(3) for kx in range(3)]
            + [(2 * ky, 2 * kx) for ky in range(3) for kx in range(3)])
    for b, (oy, ox) in enumerate(taps):
        s = oy * Wp + ox             # flat shift for this tap
        for n in range(N):
            rhs_ref[b * Cin:(b + 1) * Cin, n * L:(n + 1) * L] = xpad_ref[n, :, s:s + L]

    # ---- 3) single MXU matmul, f32 accumulation, lane-dense (Cout, N*L) result ----
    acc = jnp.dot(w_ref[...], rhs_ref[...], preferred_element_type=jnp.float32)

    # ---- 4) fused BatchNorm: batch stats over valid columns only, then affine apply ----
    mask = mask_ref[...]                                       # (1, N*L)
    mean = jnp.sum(acc * mask, axis=1, keepdims=True) / cnt    # (Cout, 1)
    diff = (acc - mean) * mask
    var = jnp.sum(diff * diff, axis=1, keepdims=True) / cnt    # biased variance, two-pass
    scale = gamma_ref[...] * jax.lax.rsqrt(var + EPS)          # (Cout, 1)
    shift = beta_ref[...] - mean * scale
    o_ref[...] = (acc * scale + shift).astype(o_ref.dtype)


def init_params(key, in_c, out_c):
    """Deterministic synthetic parameters matching the PyTorch module's shapes."""
    k1, k2, k3 = jax.random.split(key, 3)
    w11 = jax.random.normal(k1, (in_c, out_c), jnp.float32) * 0.2        # 1x1
    w33 = jax.random.normal(k2, (9, in_c, out_c), jnp.float32) * 0.1     # 3x3, taps row-major
    w33d = jax.random.normal(k3, (9, in_c, out_c), jnp.float32) * 0.1    # 3x3 dilated
    gamma = jnp.ones((out_c,), jnp.float32)   # BatchNorm2d default init
    beta = jnp.zeros((out_c,), jnp.float32)
    return {"w11": w11, "w33": w33, "w33d": w33d, "gamma": gamma, "beta": beta}


@jax.jit
def feature_fuse_forward(x_nchw, w11, w33, w33d, gamma, beta):
    x = x_nchw.astype(jnp.float32)
    N, Cin, H, W = x.shape
    Cout = w11.shape[-1]
    Wp = W + 4                      # pad 2 left + 2 right
    Hp = H + 5                      # pad 2 top + 3 bottom (uniform tap-slice length)
    L = H * Wp

    # Pack the three conv weights into one (Cout, 19*Cin) matmul LHS.
    w33_t = jnp.transpose(w33, (2, 0, 1)).reshape(Cout, 9 * Cin)    # [:, t*Cin+c] = w33[t,c,:]
    w33d_t = jnp.transpose(w33d, (2, 0, 1)).reshape(Cout, 9 * Cin)
    w_packed = jnp.concatenate([w11.T, w33_t, w33d_t], axis=1)      # (Cout, 19*Cin)

    # 0/1 mask over flat padded-width columns (valid iff column % Wp < W); constant under jit.
    col = jnp.arange(N * L, dtype=jnp.int32) % Wp
    mask = (col < W).astype(jnp.float32).reshape(1, N * L)

    kernel = functools.partial(feature_fuse_kernel, H=H, W=W, Wp=Wp)

    y_flat = pl.pallas_call(
        kernel,
        out_shape=jax.ShapeDtypeStruct((Cout, N * L), jnp.float32),
        grid=(1,),
        in_specs=[
            pl.BlockSpec((N, Cin, H * W), lambda i: (0, 0, 0)),
            pl.BlockSpec((Cout, 19 * Cin), lambda i: (0, 0)),
            pl.BlockSpec((1, N * L), lambda i: (0, 0)),
            pl.BlockSpec((Cout, 1), lambda i: (0, 0)),
            pl.BlockSpec((Cout, 1), lambda i: (0, 0)),
        ],
        out_specs=pl.BlockSpec((Cout, N * L), lambda i: (0, 0)),
        scratch_shapes=[
            pltpu.VMEM((N, Cin, Hp * Wp), jnp.float32),   # zero-padded flat input
            pltpu.VMEM((19 * Cin, N * L), jnp.float32),   # im2col RHS
        ],
        compiler_params=pltpu.CompilerParams(dimension_semantics=("arbitrary",)),
    )(x.reshape(N, Cin, H * W), w_packed, mask,
      gamma.reshape(Cout, 1), beta.reshape(Cout, 1))

    # Drop the padded-width columns and restore NCHW (cheap XLA layout plumbing on ~20 KB).
    y = y_flat.reshape(Cout, N, H, Wp)[:, :, :, :W]
    return jnp.transpose(y, (1, 0, 2, 3))


def feature_fuse_reference(x_nchw, w11, w33, w33d, gamma, beta):
    """Pure-JAX reference (lax conv) for correctness checking."""
    x = jnp.transpose(x_nchw, (0, 2, 3, 1)).astype(jnp.float32)  # NHWC
    dn = lax.conv_dimension_numbers(x.shape, (1, 1, w11.shape[0], w11.shape[1]),
                                    ("NHWC", "HWIO", "NHWC"))
    k11 = w11.reshape(1, 1, *w11.shape)
    k33 = w33.reshape(3, 3, w33.shape[1], w33.shape[2])
    k33d = w33d.reshape(3, 3, w33d.shape[1], w33d.shape[2])
    x1 = lax.conv_general_dilated(x, k11, (1, 1), "VALID", dimension_numbers=dn)
    x2 = lax.conv_general_dilated(x, k33, (1, 1), ((1, 1), (1, 1)), dimension_numbers=dn)
    x3 = lax.conv_general_dilated(x, k33d, (1, 1), ((2, 2), (2, 2)),
                                  rhs_dilation=(2, 2), dimension_numbers=dn)
    s = x1 + x2 + x3
    mean = jnp.mean(s, axis=(0, 1, 2))
    var = jnp.mean((s - mean) ** 2, axis=(0, 1, 2))
    out = (s - mean) / jnp.sqrt(var + EPS) * gamma + beta
    return jnp.transpose(out, (0, 3, 1, 2))


if __name__ == "__main__":
    key = jax.random.PRNGKey(0)
    k_x, k_p = jax.random.split(key)

    N, C_IN, C_OUT, H, W = 2, 4, 8, 16, 16
    x = jax.random.normal(k_x, (N, C_IN, H, W), jnp.float32)
    params = init_params(k_p, C_IN, C_OUT)

    out = feature_fuse_forward(x, params["w11"], params["w33"], params["w33d"],
                               params["gamma"], params["beta"])
    out = jax.block_until_ready(out)

    ref = feature_fuse_reference(x, params["w11"], params["w33"], params["w33d"],
                                 params["gamma"], params["beta"])
    assert out.shape == (N, C_OUT, H, W)
    assert jnp.allclose(out, ref, atol=2e-3, rtol=2e-3), float(jnp.max(jnp.abs(out - ref)))

    print("KERNEL_OK")
</pallas_src>

<mosaic_0001>
module attributes {stable_mosaic.version = 11 : i64} {
  func.func @feature_fuse_kernel(%arg0: i32, %arg1: memref<2x4x256xf32, #tpu.memory_space<vmem>>, %arg2: memref<8x76xf32, #tpu.memory_space<vmem>>, %arg3: memref<1x640xf32, #tpu.memory_space<vmem>>, %arg4: memref<8x1xf32, #tpu.memory_space<vmem>>, %arg5: memref<8x1xf32, #tpu.memory_space<vmem>>, %arg6: memref<8x640xf32, #tpu.memory_space<vmem>>, %arg7: memref<2x4x420xf32, #tpu.memory_space<vmem>>, %arg8: memref<76x640xf32, #tpu.memory_space<vmem>>) attributes {dimension_semantics = [#tpu.dimension_semantics<arbitrary>], iteration_bounds = array<i64: 1>, scalar_prefetch = 0 : i64, scratch_operands = 2 : i64, tpu.core_type = #tpu.core_type<tc>, window_params = [{pipeline_mode = #tpu.pipeline_mode<synchronous>, transform_indices = @transform_0, window_bounds = array<i64: 2, 4, 256>}, {pipeline_mode = #tpu.pipeline_mode<synchronous>, transform_indices = @transform_1, window_bounds = array<i64: 8, 76>}, {pipeline_mode = #tpu.pipeline_mode<synchronous>, transform_indices = @transform_2, window_bounds = array<i64: 1, 640>}, {pipeline_mode = #tpu.pipeline_mode<synchronous>, transform_indices = @transform_3, window_bounds = array<i64: 8, 1>}, {pipeline_mode = #tpu.pipeline_mode<synchronous>, transform_indices = @transform_4, window_bounds = array<i64: 8, 1>}, {pipeline_mode = #tpu.pipeline_mode<synchronous>, transform_indices = @transform_5, window_bounds = array<i64: 8, 640>}]} {
    %cst = arith.constant 0.000000e+00 : f32
    %0 = vector.broadcast %cst : f32 to vector<2x4x420xf32>
    %c0 = arith.constant 0 : index
    %c0_0 = arith.constant 0 : index
    %c0_1 = arith.constant 0 : index
    %1 = vector.load %arg7[%c0, %c0_0, %c0_1] : memref<2x4x420xf32, #tpu.memory_space<vmem>>, vector<2x4x420xf32>
    tpu.vector_store %arg7[%c0, %c0_0, %c0_1], %0 {strides = array<i32>} : memref<2x4x420xf32, #tpu.memory_space<vmem>>, vector<2x4x420xf32>,
    %c0_2 = arith.constant 0 : index
    %c0_3 = arith.constant 0 : index
    %c0_4 = arith.constant 0 : index
    %2 = vector.load %arg1[%c0_2, %c0_3, %c0_4] : memref<2x4x256xf32, #tpu.memory_space<vmem>>, vector<2x4x16xf32>
    %c0_5 = arith.constant 0 : index
    %c0_6 = arith.constant 0 : index
    %c42 = arith.constant 42 : index
    %3 = vector.load %arg7[%c0_5, %c0_6, %c42] : memref<2x4x420xf32, #tpu.memory_space<vmem>>, vector<2x4x16xf32>
    tpu.vector_store %arg7[%c0_5, %c0_6, %c42], %2 {strides = array<i32>} : memref<2x4x420xf32, #tpu.memory_space<vmem>>, vector<2x4x16xf32>,
    %c0_7 = arith.constant 0 : index
    %c0_8 = arith.constant 0 : index
    %c16 = arith.constant 16 : index
    %4 = vector.load %arg1[%c0_7, %c0_8, %c16] : memref<2x4x256xf32, #tpu.memory_space<vmem>>, vector<2x4x16xf32>
    %c0_9 = arith.constant 0 : index
    %c0_10 = arith.constant 0 : index
    %c62 = arith.constant 62 : index
    %5 = vector.load %arg7[%c0_9, %c0_10, %c62] : memref<2x4x420xf32, #tpu.memory_space<vmem>>, vector<2x4x16xf32>
    tpu.vector_store %arg7[%c0_9, %c0_10, %c62], %4 {strides = array<i32>} : memref<2x4x420xf32, #tpu.memory_space<vmem>>, vector<2x4x16xf32>,
    %c0_11 = arith.constant 0 : index
    %c0_12 = arith.constant 0 : index
    %c32 = arith.constant 32 : index
    %6 = vector.load %arg1[%c0_11, %c0_12, %c32] : memref<2x4x256xf32, #tpu.memory_space<vmem>>, vector<2x4x16xf32>
    %c0_13 = arith.constant 0 : index
    %c0_14 = arith.constant 0 : index
    %c82 = arith.constant 82 : index
    %7 = vector.load %arg7[%c0_13, %c0_14, %c82] : memref<2x4x420xf32, #tpu.memory_space<vmem>>, vector<2x4x16xf32>
    tpu.vector_store %arg7[%c0_13, %c0_14, %c82], %6 {strides = array<i32>} : memref<2x4x420xf32, #tpu.memory_space<vmem>>, vector<2x4x16xf32>,
    %c0_15 = arith.constant 0 : index
    %c0_16 = arith.constant 0 : index
    %c48 = arith.constant 48 : index
    %8 = vector.load %arg1[%c0_15, %c0_16, %c48] : memref<2x4x256xf32, #tpu.memory_space<vmem>>, vector<2x4x16xf32>
    %c0_17 = arith.constant 0 : index
    %c0_18 = arith.constant 0 : index
    %c102 = arith.constant 102 : index
    %9 = vector.load %arg7[%c0_17, %c0_18, %c102] : memref<2x4x420xf32, #tpu.memory_space<vmem>>, vector<2x4x16xf32>
    tpu.vector_store %arg7[%c0_17, %c0_18, %c102], %8 {strides = array<i32>} : memref<2x4x420xf32, #tpu.memory_space<vmem>>, vector<2x4x16xf32>,
    %c0_19 = arith.constant 0 : index
    %c0_20 = arith.constant 0 : index
    %c64 = arith.constant 64 : index
    %10 = vector.load %arg1[%c0_19, %c0_20, %c64] : memref<2x4x256xf32, #tpu.memory_space<vmem>>, vector<2x4x16xf32>
    %c0_21 = arith.constant 0 : index
    %c0_22 = arith.constant 0 : index
    %c122 = arith.constant 122 : index
    %11 = vector.load %arg7[%c0_21, %c0_22, %c122] : memref<2x4x420xf32, #tpu.memory_space<vmem>>, vector<2x4x16xf32>
    tpu.vector_store %arg7[%c0_21, %c0_22, %c122], %10 {strides = array<i32>} : memref<2x4x420xf32, #tpu.memory_space<vmem>>, vector<2x4x16xf32>,
    %c0_23 = arith.constant 0 : index
    %c0_24 = arith.constant 0 : index
    %c80 = arith.constant 80 : index
    %12 = vector.load %arg1[%c0_23, %c0_24, %c80] : memref<2x4x256xf32, #tpu.memory_space<vmem>>, vector<2x4x16xf32>
    %c0_25 = arith.constant 0 : index
    %c0_26 = arith.constant 0 : index
    %c142 = arith.constant 142 : index
    %13 = vector.load %arg7[%c0_25, %c0_26, %c142] : memref<2x4x420xf32, #tpu.memory_space<vmem>>, vector<2x4x16xf32>
    tpu.vector_store %arg7[%c0_25, %c0_26, %c142], %12 {strides = array<i32>} : memref<2x4x420xf32, #tpu.memory_space<vmem>>, vector<2x4x16xf32>,
    %c0_27 = arith.constant 0 : index
    %c0_28 = arith.constant 0 : index
    %c96 = arith.constant 96 : index
    %14 = vector.load %arg1[%c0_27, %c0_28, %c96] : memref<2x4x256xf32, #tpu.memory_space<vmem>>, vector<2x4x16xf32>
    %c0_29 = arith.constant 0 : index
    %c0_30 = arith.constant 0 : index
    %c162 = arith.constant 162 : index
    %15 = vector.load %arg7[%c0_29, %c0_30, %c162] : memref<2x4x420xf32, #tpu.memory_space<vmem>>, vector<2x4x16xf32>
    tpu.vector_store %arg7[%c0_29, %c0_30, %c162], %14 {strides = array<i32>} : memref<2x4x420xf32, #tpu.memory_space<vmem>>, vector<2x4x16xf32>,
    %c0_31 = arith.constant 0 : index
    %c0_32 = arith.constant 0 : index
    %c112 = arith.constant 112 : index
    %16 = vector.load %arg1[%c0_31, %c0_32, %c112] : memref<2x4x256xf32, #tpu.memory_space<vmem>>, vector<2x4x16xf32>
    %c0_33 = arith.constant 0 : index
    %c0_34 = arith.constant 0 : index
    %c182 = arith.constant 182 : index
    %17 = vector.load %arg7[%c0_33, %c0_34, %c182] : memref<2x4x420xf32, #tpu.memory_space<vmem>>, vector<2x4x16xf32>
    tpu.vector_store %arg7[%c0_33, %c0_34, %c182], %16 {strides = array<i32>} : memref<2x4x420xf32, #tpu.memory_space<vmem>>, vector<2x4x16xf32>,
    %c0_35 = arith.constant 0 : index
    %c0_36 = arith.constant 0 : index
    %c128 = arith.constant 128 : index
    %18 = vector.load %arg1[%c0_35, %c0_36, %c128] : memref<2x4x256xf32, #tpu.memory_space<vmem>>, vector<2x4x16xf32>
    %c0_37 = arith.constant 0 : index
    %c0_38 = arith.constant 0 : index
    %c202 = arith.constant 202 : index
    %19 = vector.load %arg7[%c0_37, %c0_38, %c202] : memref<2x4x420xf32, #tpu.memory_space<vmem>>, vector<2x4x16xf32>
    tpu.vector_store %arg7[%c0_37, %c0_38, %c202], %18 {strides = array<i32>} : memref<2x4x420xf32, #tpu.memory_space<vmem>>, vector<2x4x16xf32>,
    %c0_39 = arith.constant 0 : index
    %c0_40 = arith.constant 0 : index
    %c144 = arith.constant 144 : index
    %20 = vector.load %arg1[%c0_39, %c0_40, %c144] : memref<2x4x256xf32, #tpu.memory_space<vmem>>, vector<2x4x16xf32>
    %c0_41 = arith.constant 0 : index
    %c0_42 = arith.constant 0 : index
    %c222 = arith.constant 222 : index
    %21 = vector.load %arg7[%c0_41, %c0_42, %c222] : memref<2x4x420xf32, #tpu.memory_space<vmem>>, vector<2x4x16xf32>
    tpu.vector_store %arg7[%c0_41, %c0_42, %c222], %20 {strides = array<i32>} : memref<2x4x420xf32, #tpu.memory_space<vmem>>, vector<2x4x16xf32>,
    %c0_43 = arith.constant 0 : index
    %c0_44 = arith.constant 0 : index
    %c160 = arith.constant 160 : index
    %22 = vector.load %arg1[%c0_43, %c0_44, %c160] : memref<2x4x256xf32, #tpu.memory_space<vmem>>, vector<2x4x16xf32>
    %c0_45 = arith.constant 0 : index
    %c0_46 = arith.constant 0 : index
    %c242 = arith.constant 242 : index
    %23 = vector.load %arg7[%c0_45, %c0_46, %c242] : memref<2x4x420xf32, #tpu.memory_space<vmem>>, vector<2x4x16xf32>
    tpu.vector_store %arg7[%c0_45, %c0_46, %c242], %22 {strides = array<i32>} : memref<2x4x420xf32, #tpu.memory_space<vmem>>, vector<2x4x16xf32>,
    %c0_47 = arith.constant 0 : index
    %c0_48 = arith.constant 0 : index
    %c176 = arith.constant 176 : index
    %24 = vector.load %arg1[%c0_47, %c0_48, %c176] : memref<2x4x256xf32, #tpu.memory_space<vmem>>, vector<2x4x16xf32>
    %c0_49 = arith.constant 0 : index
    %c0_50 = arith.constant 0 : index
    %c262 = arith.constant 262 : index
    %25 = vector.load %arg7[%c0_49, %c0_50, %c262] : memref<2x4x420xf32, #tpu.memory_space<vmem>>, vector<2x4x16xf32>
    tpu.vector_store %arg7[%c0_49, %c0_50, %c262], %24 {strides = array<i32>} : memref<2x4x420xf32, #tpu.memory_space<vmem>>, vector<2x4x16xf32>,
    %c0_51 = arith.constant 0 : index
    %c0_52 = arith.constant 0 : index
    %c192 = arith.constant 192 : index
    %26 = vector.load %arg1[%c0_51, %c0_52, %c192] : memref<2x4x256xf32, #tpu.memory_space<vmem>>, vector<2x4x16xf32>
    %c0_53 = arith.constant 0 : index
    %c0_54 = arith.constant 0 : index
    %c282 = arith.constant 282 : index
    %27 = vector.load %arg7[%c0_53, %c0_54, %c282] : memref<2x4x420xf32, #tpu.memory_space<vmem>>, vector<2x4x16xf32>
    tpu.vector_store %arg7[%c0_53, %c0_54, %c282], %26 {strides = array<i32>} : memref<2x4x420xf32, #tpu.memory_space<vmem>>, vector<2x4x16xf32>,
    %c0_55 = arith.constant 0 : index
    %c0_56 = arith.constant 0 : index
    %c208 = arith.constant 208 : index
    %28 = vector.load %arg1[%c0_55, %c0_56, %c208] : memref<2x4x256xf32, #tpu.memory_space<vmem>>, vector<2x4x16xf32>
    %c0_57 = arith.constant 0 : index
    %c0_58 = arith.constant 0 : index
    %c302 = arith.constant 302 : index
    %29 = vector.load %arg7[%c0_57, %c0_58, %c302] : memref<2x4x420xf32, #tpu.memory_space<vmem>>, vector<2x4x16xf32>
    tpu.vector_store %arg7[%c0_57, %c0_58, %c302], %28 {strides = array<i32>} : memref<2x4x420xf32, #tpu.memory_space<vmem>>, vector<2x4x16xf32>,
    %c0_59 = arith.constant 0 : index
    %c0_60 = arith.constant 0 : index
    %c224 = arith.constant 224 : index
    %30 = vector.load %arg1[%c0_59, %c0_60, %c224] : memref<2x4x256xf32, #tpu.memory_space<vmem>>, vector<2x4x16xf32>
    %c0_61 = arith.constant 0 : index
    %c0_62 = arith.constant 0 : index
    %c322 = arith.constant 322 : index
    %31 = vector.load %arg7[%c0_61, %c0_62, %c322] : memref<2x4x420xf32, #tpu.memory_space<vmem>>, vector<2x4x16xf32>
    tpu.vector_store %arg7[%c0_61, %c0_62, %c322], %30 {strides = array<i32>} : memref<2x4x420xf32, #tpu.memory_space<vmem>>, vector<2x4x16xf32>,
    %c0_63 = arith.constant 0 : index
    %c0_64 = arith.constant 0 : index
    %c240 = arith.constant 240 : index
    %32 = vector.load %arg1[%c0_63, %c0_64, %c240] : memref<2x4x256xf32, #tpu.memory_space<vmem>>, vector<2x4x16xf32>
    %c0_65 = arith.constant 0 : index
    %c0_66 = arith.constant 0 : index
    %c342 = arith.constant 342 : index
    %33 = vector.load %arg7[%c0_65, %c0_66, %c342] : memref<2x4x420xf32, #tpu.memory_space<vmem>>, vector<2x4x16xf32>
    tpu.vector_store %arg7[%c0_65, %c0_66, %c342], %32 {strides = array<i32>} : memref<2x4x420xf32, #tpu.memory_space<vmem>>, vector<2x4x16xf32>,
    %c0_67 = arith.constant 0 : index
    %c0_68 = arith.constant 0 : index
    %c42_69 = arith.constant 42 : index
    %34 = vector.load %arg7[%c0_67, %c0_68, %c42_69] : memref<2x4x420xf32, #tpu.memory_space<vmem>>, vector<1x4x320xf32>
    %35 = vector.shape_cast %34 : vector<1x4x320xf32> to vector<4x320xf32>
    %c0_70 = arith.constant 0 : index
    %c0_71 = arith.constant 0 : index
    %36 = vector.load %arg8[%c0_70, %c0_71] : memref<76x640xf32, #tpu.memory_space<vmem>>, vector<4x320xf32>
    tpu.vector_store %arg8[%c0_70, %c0_71], %35 {strides = array<i32>} : memref<76x640xf32, #tpu.memory_space<vmem>>, vector<4x320xf32>,
    %c1 = arith.constant 1 : index
    %c0_72 = arith.constant 0 : index
    %c42_73 = arith.constant 42 : index
    %37 = vector.load %arg7[%c1, %c0_72, %c42_73] : memref<2x4x420xf32, #tpu.memory_space<vmem>>, vector<1x4x320xf32>
    %38 = vector.shape_cast %37 : vector<1x4x320xf32> to vector<4x320xf32>
    %c0_74 = arith.constant 0 : index
    %c320 = arith.constant 320 : index
    %39 = vector.load %arg8[%c0_74, %c320] : memref<76x640xf32, #tpu.memory_space<vmem>>, vector<4x320xf32>
    tpu.vector_store %arg8[%c0_74, %c320], %38 {strides = array<i32>} : memref<76x640xf32, #tpu.memory_space<vmem>>, vector<4x320xf32>,
    %c0_75 = arith.constant 0 : index
    %c0_76 = arith.constant 0 : index
    %c21 = arith.constant 21 : index
    %40 = vector.load %arg7[%c0_75, %c0_76, %c21] : memref<2x4x420xf32, #tpu.memory_space<vmem>>, vector<1x4x320xf32>
    %41 = vector.shape_cast %40 : vector<1x4x320xf32> to vector<4x320xf32>
    %c4 = arith.constant 4 : index
    %c0_77 = arith.constant 0 : index
    %42 = vector.load %arg8[%c4, %c0_77] : memref<76x640xf32, #tpu.memory_space<vmem>>, vector<4x320xf32>
    tpu.vector_store %arg8[%c4, %c0_77], %41 {strides = array<i32>} : memref<76x640xf32, #tpu.memory_space<vmem>>, vector<4x320xf32>,
    %c1_78 = arith.constant 1 : index
    %c0_79 = arith.constant 0 : index
    %c21_80 = arith.constant 21 : index
    %43 = vector.load %arg7[%c1_78, %c0_79, %c21_80] : memref<2x4x420xf32, #tpu.memory_space<vmem>>, vector<1x4x320xf32>
    %44 = vector.shape_cast %43 : vector<1x4x320xf32> to vector<4x320xf32>
    %c4_81 = arith.constant 4 : index
    %c320_82 = arith.constant 320 : index
    %45 = vector.load %arg8[%c4_81, %c320_82] : memref<76x640xf32, #tpu.memory_space<vmem>>, vector<4x320xf32>
    tpu.vector_store %arg8[%c4_81, %c320_82], %44 {strides = array<i32>} : memref<76x640xf32, #tpu.memory_space<vmem>>, vector<4x320xf32>,
    %c0_83 = arith.constant 0 : index
    %c0_84 = arith.constant 0 : index
    %c22 = arith.constant 22 : index
    %46 = vector.load %arg7[%c0_83, %c0_84, %c22] : memref<2x4x420xf32, #tpu.memory_space<vmem>>, vector<1x4x320xf32>
    %47 = vector.shape_cast %46 : vector<1x4x320xf32> to vector<4x320xf32>
    %c8 = arith.constant 8 : index
    %c0_85 = arith.constant 0 : index
    %48 = vector.load %arg8[%c8, %c0_85] : memref<76x640xf32, #tpu.memory_space<vmem>>, vector<4x320xf32>
    tpu.vector_store %arg8[%c8, %c0_85], %47 {strides = array<i32>} : memref<76x640xf32, #tpu.memory_space<vmem>>, vector<4x320xf32>,
    %c1_86 = arith.constant 1 : index
    %c0_87 = arith.constant 0 : index
    %c22_88 = arith.constant 22 : index
    %49 = vector.load %arg7[%c1_86, %c0_87, %c22_88] : memref<2x4x420xf32, #tpu.memory_space<vmem>>, vector<1x4x320xf32>
    %50 = vector.shape_cast %49 : vector<1x4x320xf32> to vector<4x320xf32>
    %c8_89 = arith.constant 8 : index
    %c320_90 = arith.constant 320 : index
    %51 = vector.load %arg8[%c8_89, %c320_90] : memref<76x640xf32, #tpu.memory_space<vmem>>, vector<4x320xf32>
    tpu.vector_store %arg8[%c8_89, %c320_90], %50 {strides = array<i32>} : memref<76x640xf32, #tpu.memory_space<vmem>>, vector<4x320xf32>,
    %c0_91 = arith.constant 0 : index
    %c0_92 = arith.constant 0 : index
    %c23 = arith.constant 23 : index
    %52 = vector.load %arg7[%c0_91, %c0_92, %c23] : memref<2x4x420xf32, #tpu.memory_space<vmem>>, vector<1x4x320xf32>
    %53 = vector.shape_cast %52 : vector<1x4x320xf32> to vector<4x320xf32>
    %c12 = arith.constant 12 : index
    %c0_93 = arith.constant 0 : index
    %54 = vector.load %arg8[%c12, %c0_93] : memref<76x640xf32, #tpu.memory_space<vmem>>, vector<4x320xf32>
    tpu.vector_store %arg8[%c12, %c0_93], %53 {strides = array<i32>} : memref<76x640xf32, #tpu.memory_space<vmem>>, vector<4x320xf32>,
    %c1_94 = arith.constant 1 : index
    %c0_95 = arith.constant 0 : index
    %c23_96 = arith.constant 23 : index
    %55 = vector.load %arg7[%c1_94, %c0_95, %c23_96] : memref<2x4x420xf32, #tpu.memory_space<vmem>>, vector<1x4x320xf32>
    %56 = vector.shape_cast %55 : vector<1x4x320xf32> to vector<4x320xf32>
    %c12_97 = arith.constant 12 : index
    %c320_98 = arith.constant 320 : index
    %57 = vector.load %arg8[%c12_97, %c320_98] : memref<76x640xf32, #tpu.memory_space<vmem>>, vector<4x320xf32>
    tpu.vector_store %arg8[%c12_97, %c320_98], %56 {strides = array<i32>} : memref<76x640xf32, #tpu.memory_space<vmem>>, vector<4x320xf32>,
    %c0_99 = arith.constant 0 : index
    %c0_100 = arith.constant 0 : index
    %c41 = arith.constant 41 : index
    %58 = vector.load %arg7[%c0_99, %c0_100, %c41] : memref<2x4x420xf32, #tpu.memory_space<vmem>>, vector<1x4x320xf32>
    %59 = vector.shape_cast %58 : vector<1x4x320xf32> to vector<4x320xf32>
    %c16_101 = arith.constant 16 : index
    %c0_102 = arith.constant 0 : index
    %60 = vector.load %arg8[%c16_101, %c0_102] : memref<76x640xf32, #tpu.memory_space<vmem>>, vector<4x320xf32>
    tpu.vector_store %arg8[%c16_101, %c0_102], %59 {strides = array<i32>} : memref<76x640xf32, #tpu.memory_space<vmem>>, vector<4x320xf32>,
    %c1_103 = arith.constant 1 : index
    %c0_104 = arith.constant 0 : index
    %c41_105 = arith.constant 41 : index
    %61 = vector.load %arg7[%c1_103, %c0_104, %c41_105] : memref<2x4x420xf32, #tpu.memory_space<vmem>>, vector<1x4x320xf32>
    %62 = vector.shape_cast %61 : vector<1x4x320xf32> to vector<4x320xf32>
    %c16_106 = arith.constant 16 : index
    %c320_107 = arith.constant 320 : index
    %63 = vector.load %arg8[%c16_106, %c320_107] : memref<76x640xf32, #tpu.memory_space<vmem>>, vector<4x320xf32>
    tpu.vector_store %arg8[%c16_106, %c320_107], %62 {strides = array<i32>} : memref<76x640xf32, #tpu.memory_space<vmem>>, vector<4x320xf32>,
    %c0_108 = arith.constant 0 : index
    %c0_109 = arith.constant 0 : index
    %c42_110 = arith.constant 42 : index
    %64 = vector.load %arg7[%c0_108, %c0_109, %c42_110] : memref<2x4x420xf32, #tpu.memory_space<vmem>>, vector<1x4x320xf32>
    %65 = vector.shape_cast %64 : vector<1x4x320xf32> to vector<4x320xf32>
    %c20 = arith.constant 20 : index
    %c0_111 = arith.constant 0 : index
    %66 = vector.load %arg8[%c20, %c0_111] : memref<76x640xf32, #tpu.memory_space<vmem>>, vector<4x320xf32>
    tpu.vector_store %arg8[%c20, %c0_111], %65 {strides = array<i32>} : memref<76x640xf32, #tpu.memory_space<vmem>>, vector<4x320xf32>,
    %c1_112 = arith.constant 1 : index
    %c0_113 = arith.constant 0 : index
    %c42_114 = arith.constant 42 : index
    %67 = vector.load %arg7[%c1_112, %c0_113, %c42_114] : memref<2x4x420xf32, #tpu.memory_space<vmem>>, vector<1x4x320xf32>
    %68 = vector.shape_cast %67 : vector<1x4x320xf32> to vector<4x320xf32>
    %c20_115 = arith.constant 20 : index
    %c320_116 = arith.constant 320 : index
    %69 = vector.load %arg8[%c20_115, %c320_116] : memref<76x640xf32, #tpu.memory_space<vmem>>, vector<4x320xf32>
    tpu.vector_store %arg8[%c20_115, %c320_116], %68 {strides = array<i32>} : memref<76x640xf32, #tpu.memory_space<vmem>>, vector<4x320xf32>,
    %c0_117 = arith.constant 0 : index
    %c0_118 = arith.constant 0 : index
    %c43 = arith.constant 43 : index
    %70 = vector.load %arg7[%c0_117, %c0_118, %c43] : memref<2x4x420xf32, #tpu.memory_space<vmem>>, vector<1x4x320xf32>
    %71 = vector.shape_cast %70 : vector<1x4x320xf32> to vector<4x320xf32>
    %c24 = arith.constant 24 : index
    %c0_119 = arith.constant 0 : index
    %72 = vector.load %arg8[%c24, %c0_119] : memref<76x640xf32, #tpu.memory_space<vmem>>, vector<4x320xf32>
    tpu.vector_store %arg8[%c24, %c0_119], %71 {strides = array<i32>} : memref<76x640xf32, #tpu.memory_space<vmem>>, vector<4x320xf32>,
    %c1_120 = arith.constant 1 : index
    %c0_121 = arith.constant 0 : index
    %c43_122 = arith.constant 43 : index
    %73 = vector.load %arg7[%c1_120, %c0_121, %c43_122] : memref<2x4x420xf32, #tpu.memory_space<vmem>>, vector<1x4x320xf32>
    %74 = vector.shape_cast %73 : vector<1x4x320xf32> to vector<4x320xf32>
    %c24_123 = arith.constant 24 : index
    %c320_124 = arith.constant 320 : index
    %75 = vector.load %arg8[%c24_123, %c320_124] : memref<76x640xf32, #tpu.memory_space<vmem>>, vector<4x320xf32>
    tpu.vector_store %arg8[%c24_123, %c320_124], %74 {strides = array<i32>} : memref<76x640xf32, #tpu.memory_space<vmem>>, vector<4x320xf32>,
    %c0_125 = arith.constant 0 : index
    %c0_126 = arith.constant 0 : index
    %c61 = arith.constant 61 : index
    %76 = vector.load %arg7[%c0_125, %c0_126, %c61] : memref<2x4x420xf32, #tpu.memory_space<vmem>>, vector<1x4x320xf32>
    %77 = vector.shape_cast %76 : vector<1x4x320xf32> to vector<4x320xf32>
    %c28 = arith.constant 28 : index
    %c0_127 = arith.constant 0 : index
    %78 = vector.load %arg8[%c28, %c0_127] : memref<76x640xf32, #tpu.memory_space<vmem>>, vector<4x320xf32>
    tpu.vector_store %arg8[%c28, %c0_127], %77 {strides = array<i32>} : memref<76x640xf32, #tpu.memory_space<vmem>>, vector<4x320xf32>,
    %c1_128 = arith.constant 1 : index
    %c0_129 = arith.constant 0 : index
    %c61_130 = arith.constant 61 : index
    %79 = vector.load %arg7[%c1_128, %c0_129, %c61_130] : memref<2x4x420xf32, #tpu.memory_space<vmem>>, vector<1x4x320xf32>
    %80 = vector.shape_cast %79 : vector<1x4x320xf32> to vector<4x320xf32>
    %c28_131 = arith.constant 28 : index
    %c320_132 = arith.constant 320 : index
    %81 = vector.load %arg8[%c28_131, %c320_132] : memref<76x640xf32, #tpu.memory_space<vmem>>, vector<4x320xf32>
    tpu.vector_store %arg8[%c28_131, %c320_132], %80 {strides = array<i32>} : memref<76x640xf32, #tpu.memory_space<vmem>>, vector<4x320xf32>,
    %c0_133 = arith.constant 0 : index
    %c0_134 = arith.constant 0 : index
    %c62_135 = arith.constant 62 : index
    %82 = vector.load %arg7[%c0_133, %c0_134, %c62_135] : memref<2x4x420xf32, #tpu.memory_space<vmem>>, vector<1x4x320xf32>
    %83 = vector.shape_cast %82 : vector<1x4x320xf32> to vector<4x320xf32>
    %c32_136 = arith.constant 32 : index
    %c0_137 = arith.constant 0 : index
    %84 = vector.load %arg8[%c32_136, %c0_137] : memref<76x640xf32, #tpu.memory_space<vmem>>, vector<4x320xf32>
    tpu.vector_store %arg8[%c32_136, %c0_137], %83 {strides = array<i32>} : memref<76x640xf32, #tpu.memory_space<vmem>>, vector<4x320xf32>,
    %c1_138 = arith.constant 1 : index
    %c0_139 = arith.constant 0 : index
    %c62_140 = arith.constant 62 : index
    %85 = vector.load %arg7[%c1_138, %c0_139, %c62_140] : memref<2x4x420xf32, #tpu.memory_space<vmem>>, vector<1x4x320xf32>
    %86 = vector.shape_cast %85 : vector<1x4x320xf32> to vector<4x320xf32>
    %c32_141 = arith.constant 32 : index
    %c320_142 = arith.constant 320 : index
    %87 = vector.load %arg8[%c32_141, %c320_142] : memref<76x640xf32, #tpu.memory_space<vmem>>, vector<4x320xf32>
    tpu.vector_store %arg8[%c32_141, %c320_142], %86 {strides = array<i32>} : memref<76x640xf32, #tpu.memory_space<vmem>>, vector<4x320xf32>,
    %c0_143 = arith.constant 0 : index
    %c0_144 = arith.constant 0 : index
    %c63 = arith.constant 63 : index
    %88 = vector.load %arg7[%c0_143, %c0_144, %c63] : memref<2x4x420xf32, #tpu.memory_space<vmem>>, vector<1x4x320xf32>
    %89 = vector.shape_cast %88 : vector<1x4x320xf32> to vector<4x320xf32>
    %c36 = arith.constant 36 : index
    %c0_145 = arith.constant 0 : index
    %90 = vector.load %arg8[%c36, %c0_145] : memref<76x640xf32, #tpu.memory_space<vmem>>, vector<4x320xf32>
    tpu.vector_store %arg8[%c36, %c0_145], %89 {strides = array<i32>} : memref<76x640xf32, #tpu.memory_space<vmem>>, vector<4x320xf32>,
    %c1_146 = arith.constant 1 : index
    %c0_147 = arith.constant 0 : index
    %c63_148 = arith.constant 63 : index
    %91 = vector.load %arg7[%c1_146, %c0_147, %c63_148] : memref<2x4x420xf32, #tpu.memory_space<vmem>>, vector<1x4x320xf32>
    %92 = vector.shape_cast %91 : vector<1x4x320xf32> to vector<4x320xf32>
    %c36_149 = arith.constant 36 : index
    %c320_150 = arith.constant 320 : index
    %93 = vector.load %arg8[%c36_149, %c320_150] : memref<76x640xf32, #tpu.memory_space<vmem>>, vector<4x320xf32>
    tpu.vector_store %arg8[%c36_149, %c320_150], %92 {strides = array<i32>} : memref<76x640xf32, #tpu.memory_space<vmem>>, vector<4x320xf32>,
    %c0_151 = arith.constant 0 : index
    %c0_152 = arith.constant 0 : index
    %c0_153 = arith.constant 0 : index
    %94 = vector.load %arg7[%c0_151, %c0_152, %c0_153] : memref<2x4x420xf32, #tpu.memory_space<vmem>>, vector<1x4x320xf32>
    %95 = vector.shape_cast %94 : vector<1x4x320xf32> to vector<4x320xf32>
    %c40 = arith.constant 40 : index
    %c0_154 = arith.constant 0 : index
    %96 = vector.load %arg8[%c40, %c0_154] : memref<76x640xf32, #tpu.memory_space<vmem>>, vector<4x320xf32>
    tpu.vector_store %arg8[%c40, %c0_154], %95 {strides = array<i32>} : memref<76x640xf32, #tpu.memory_space<vmem>>, vector<4x320xf32>,
    %c1_155 = arith.constant 1 : index
    %c0_156 = arith.constant 0 : index
    %c0_157 = arith.constant 0 : index
    %97 = vector.load %arg7[%c1_155, %c0_156, %c0_157] : memref<2x4x420xf32, #tpu.memory_space<vmem>>, vector<1x4x320xf32>
    %98 = vector.shape_cast %97 : vector<1x4x320xf32> to vector<4x320xf32>
    %c40_158 = arith.constant 40 : index
    %c320_159 = arith.constant 320 : index
    %99 = vector.load %arg8[%c40_158, %c320_159] : memref<76x640xf32, #tpu.memory_space<vmem>>, vector<4x320xf32>
    tpu.vector_store %arg8[%c40_158, %c320_159], %98 {strides = array<i32>} : memref<76x640xf32, #tpu.memory_space<vmem>>, vector<4x320xf32>,
    %c0_160 = arith.constant 0 : index
    %c0_161 = arith.constant 0 : index
    %c2 = arith.constant 2 : index
    %100 = vector.load %arg7[%c0_160, %c0_161, %c2] : memref<2x4x420xf32, #tpu.memory_space<vmem>>, vector<1x4x320xf32>
    %101 = vector.shape_cast %100 : vector<1x4x320xf32> to vector<4x320xf32>
    %c44 = arith.constant 44 : index
    %c0_162 = arith.constant 0 : index
    %102 = vector.load %arg8[%c44, %c0_162] : memref<76x640xf32, #tpu.memory_space<vmem>>, vector<4x320xf32>
    tpu.vector_store %arg8[%c44, %c0_162], %101 {strides = array<i32>} : memref<76x640xf32, #tpu.memory_space<vmem>>, vector<4x320xf32>,
    %c1_163 = arith.constant 1 : index
    %c0_164 = arith.constant 0 : index
    %c2_165 = arith.constant 2 : index
    %103 = vector.load %arg7[%c1_163, %c0_164, %c2_165] : memref<2x4x420xf32, #tpu.memory_space<vmem>>, vector<1x4x320xf32>
    %104 = vector.shape_cast %103 : vector<1x4x320xf32> to vector<4x320xf32>
    %c44_166 = arith.constant 44 : index
    %c320_167 = arith.constant 320 : index
    %105 = vector.load %arg8[%c44_166, %c320_167] : memref<76x640xf32, #tpu.memory_space<vmem>>, vector<4x320xf32>
    tpu.vector_store %arg8[%c44_166, %c320_167], %104 {strides = array<i32>} : memref<76x640xf32, #tpu.memory_space<vmem>>, vector<4x320xf32>,
    %c0_168 = arith.constant 0 : index
    %c0_169 = arith.constant 0 : index
    %c4_170 = arith.constant 4 : index
    %106 = vector.load %arg7[%c0_168, %c0_169, %c4_170] : memref<2x4x420xf32, #tpu.memory_space<vmem>>, vector<1x4x320xf32>
    %107 = vector.shape_cast %106 : vector<1x4x320xf32> to vector<4x320xf32>
    %c48_171 = arith.constant 48 : index
    %c0_172 = arith.constant 0 : index
    %108 = vector.load %arg8[%c48_171, %c0_172] : memref<76x640xf32, #tpu.memory_space<vmem>>, vector<4x320xf32>
    tpu.vector_store %arg8[%c48_171, %c0_172], %107 {strides = array<i32>} : memref<76x640xf32, #tpu.memory_space<vmem>>, vector<4x320xf32>,
    %c1_173 = arith.constant 1 : index
    %c0_174 = arith.constant 0 : index
    %c4_175 = arith.constant 4 : index
    %109 = vector.load %arg7[%c1_173, %c0_174, %c4_175] : memref<2x4x420xf32, #tpu.memory_space<vmem>>, vector<1x4x320xf32>
    %110 = vector.shape_cast %109 : vector<1x4x320xf32> to vector<4x320xf32>
    %c48_176 = arith.constant 48 : index
    %c320_177 = arith.constant 320 : index
    %111 = vector.load %arg8[%c48_176, %c320_177] : memref<76x640xf32, #tpu.memory_space<vmem>>, vector<4x320xf32>
    tpu.vector_store %arg8[%c48_176, %c320_177], %110 {strides = array<i32>} : memref<76x640xf32, #tpu.memory_space<vmem>>, vector<4x320xf32>,
    %c0_178 = arith.constant 0 : index
    %c0_179 = arith.constant 0 : index
    %c40_180 = arith.constant 40 : index
    %112 = vector.load %arg7[%c0_178, %c0_179, %c40_180] : memref<2x4x420xf32, #tpu.memory_space<vmem>>, vector<1x4x320xf32>
    %113 = vector.shape_cast %112 : vector<1x4x320xf32> to vector<4x320xf32>
    %c52 = arith.constant 52 : index
    %c0_181 = arith.constant 0 : index
    %114 = vector.load %arg8[%c52, %c0_181] : memref<76x640xf32, #tpu.memory_space<vmem>>, vector<4x320xf32>
    tpu.vector_store %arg8[%c52, %c0_181], %113 {strides = array<i32>} : memref<76x640xf32, #tpu.memory_space<vmem>>, vector<4x320xf32>,
    %c1_182 = arith.constant 1 : index
    %c0_183 = arith.constant 0 : index
    %c40_184 = arith.constant 40 : index
    %115 = vector.load %arg7[%c1_182, %c0_183, %c40_184] : memref<2x4x420xf32, #tpu.memory_space<vmem>>, vector<1x4x320xf32>
    %116 = vector.shape_cast %115 : vector<1x4x320xf32> to vector<4x320xf32>
    %c52_185 = arith.constant 52 : index
    %c320_186 = arith.constant 320 : index
    %117 = vector.load %arg8[%c52_185, %c320_186] : memref<76x640xf32, #tpu.memory_space<vmem>>, vector<4x320xf32>
    tpu.vector_store %arg8[%c52_185, %c320_186], %116 {strides = array<i32>} : memref<76x640xf32, #tpu.memory_space<vmem>>, vector<4x320xf32>,
    %c0_187 = arith.constant 0 : index
    %c0_188 = arith.constant 0 : index
    %c42_189 = arith.constant 42 : index
    %118 = vector.load %arg7[%c0_187, %c0_188, %c42_189] : memref<2x4x420xf32, #tpu.memory_space<vmem>>, vector<1x4x320xf32>
    %119 = vector.shape_cast %118 : vector<1x4x320xf32> to vector<4x320xf32>
    %c56 = arith.constant 56 : index
    %c0_190 = arith.constant 0 : index
    %120 = vector.load %arg8[%c56, %c0_190] : memref<76x640xf32, #tpu.memory_space<vmem>>, vector<4x320xf32>
    tpu.vector_store %arg8[%c56, %c0_190], %119 {strides = array<i32>} : memref<76x640xf32, #tpu.memory_space<vmem>>, vector<4x320xf32>,
    %c1_191 = arith.constant 1 : index
    %c0_192 = arith.constant 0 : index
    %c42_193 = arith.constant 42 : index
    %121 = vector.load %arg7[%c1_191, %c0_192, %c42_193] : memref<2x4x420xf32, #tpu.memory_space<vmem>>, vector<1x4x320xf32>
    %122 = vector.shape_cast %121 : vector<1x4x320xf32> to vector<4x320xf32>
    %c56_194 = arith.constant 56 : index
    %c320_195 = arith.constant 320 : index
    %123 = vector.load %arg8[%c56_194, %c320_195] : memref<76x640xf32, #tpu.memory_space<vmem>>, vector<4x320xf32>
    tpu.vector_store %arg8[%c56_194, %c320_195], %122 {strides = array<i32>} : memref<76x640xf32, #tpu.memory_space<vmem>>, vector<4x320xf32>,
    %c0_196 = arith.constant 0 : index
    %c0_197 = arith.constant 0 : index
    %c44_198 = arith.constant 44 : index
    %124 = vector.load %arg7[%c0_196, %c0_197, %c44_198] : memref<2x4x420xf32, #tpu.memory_space<vmem>>, vector<1x4x320xf32>
    %125 = vector.shape_cast %124 : vector<1x4x320xf32> to vector<4x320xf32>
    %c60 = arith.constant 60 : index
    %c0_199 = arith.constant 0 : index
    %126 = vector.load %arg8[%c60, %c0_199] : memref<76x640xf32, #tpu.memory_space<vmem>>, vector<4x320xf32>
    tpu.vector_store %arg8[%c60, %c0_199], %125 {strides = array<i32>} : memref<76x640xf32, #tpu.memory_space<vmem>>, vector<4x320xf32>,
    %c1_200 = arith.constant 1 : index
    %c0_201 = arith.constant 0 : index
    %c44_202 = arith.constant 44 : index
    %127 = vector.load %arg7[%c1_200, %c0_201, %c44_202] : memref<2x4x420xf32, #tpu.memory_space<vmem>>, vector<1x4x320xf32>
    %128 = vector.shape_cast %127 : vector<1x4x320xf32> to vector<4x320xf32>
    %c60_203 = arith.constant 60 : index
    %c320_204 = arith.constant 320 : index
    %129 = vector.load %arg8[%c60_203, %c320_204] : memref<76x640xf32, #tpu.memory_space<vmem>>, vector<4x320xf32>
    tpu.vector_store %arg8[%c60_203, %c320_204], %128 {strides = array<i32>} : memref<76x640xf32, #tpu.memory_space<vmem>>, vector<4x320xf32>,
    %c0_205 = arith.constant 0 : index
    %c0_206 = arith.constant 0 : index
    %c80_207 = arith.constant 80 : index
    %130 = vector.load %arg7[%c0_205, %c0_206, %c80_207] : memref<2x4x420xf32, #tpu.memory_space<vmem>>, vector<1x4x320xf32>
    %131 = vector.shape_cast %130 : vector<1x4x320xf32> to vector<4x320xf32>
    %c64_208 = arith.constant 64 : index
    %c0_209 = arith.constant 0 : index
    %132 = vector.load %arg8[%c64_208, %c0_209] : memref<76x640xf32, #tpu.memory_space<vmem>>, vector<4x320xf32>
    tpu.vector_store %arg8[%c64_208, %c0_209], %131 {strides = array<i32>} : memref<76x640xf32, #tpu.memory_space<vmem>>, vector<4x320xf32>,
    %c1_210 = arith.constant 1 : index
    %c0_211 = arith.constant 0 : index
    %c80_212 = arith.constant 80 : index
    %133 = vector.load %arg7[%c1_210, %c0_211, %c80_212] : memref<2x4x420xf32, #tpu.memory_space<vmem>>, vector<1x4x320xf32>
    %134 = vector.shape_cast %133 : vector<1x4x320xf32> to vector<4x320xf32>
    %c64_213 = arith.constant 64 : index
    %c320_214 = arith.constant 320 : index
    %135 = vector.load %arg8[%c64_213, %c320_214] : memref<76x640xf32, #tpu.memory_space<vmem>>, vector<4x320xf32>
    tpu.vector_store %arg8[%c64_213, %c320_214], %134 {strides = array<i32>} : memref<76x640xf32, #tpu.memory_space<vmem>>, vector<4x320xf32>,
    %c0_215 = arith.constant 0 : index
    %c0_216 = arith.constant 0 : index
    %c82_217 = arith.constant 82 : index
    %136 = vector.load %arg7[%c0_215, %c0_216, %c82_217] : memref<2x4x420xf32, #tpu.memory_space<vmem>>, vector<1x4x320xf32>
    %137 = vector.shape_cast %136 : vector<1x4x320xf32> to vector<4x320xf32>
    %c68 = arith.constant 68 : index
    %c0_218 = arith.constant 0 : index
    %138 = vector.load %arg8[%c68, %c0_218] : memref<76x640xf32, #tpu.memory_space<vmem>>, vector<4x320xf32>
    tpu.vector_store %arg8[%c68, %c0_218], %137 {strides = array<i32>} : memref<76x640xf32, #tpu.memory_space<vmem>>, vector<4x320xf32>,
    %c1_219 = arith.constant 1 : index
    %c0_220 = arith.constant 0 : index
    %c82_221 = arith.constant 82 : index
    %139 = vector.load %arg7[%c1_219, %c0_220, %c82_221] : memref<2x4x420xf32, #tpu.memory_space<vmem>>, vector<1x4x320xf32>
    %140 = vector.shape_cast %139 : vector<1x4x320xf32> to vector<4x320xf32>
    %c68_222 = arith.constant 68 : index
    %c320_223 = arith.constant 320 : index
    %141 = vector.load %arg8[%c68_222, %c320_223] : memref<76x640xf32, #tpu.memory_space<vmem>>, vector<4x320xf32>
    tpu.vector_store %arg8[%c68_222, %c320_223], %140 {strides = array<i32>} : memref<76x640xf32, #tpu.memory_space<vmem>>, vector<4x320xf32>,
    %c0_224 = arith.constant 0 : index
    %c0_225 = arith.constant 0 : index
    %c84 = arith.constant 84 : index
    %142 = vector.load %arg7[%c0_224, %c0_225, %c84] : memref<2x4x420xf32, #tpu.memory_space<vmem>>, vector<1x4x320xf32>
    %143 = vector.shape_cast %142 : vector<1x4x320xf32> to vector<4x320xf32>
    %c72 = arith.constant 72 : index
    %c0_226 = arith.constant 0 : index
    %144 = vector.load %arg8[%c72, %c0_226] : memref<76x640xf32, #tpu.memory_space<vmem>>, vector<4x320xf32>
    tpu.vector_store %arg8[%c72, %c0_226], %143 {strides = array<i32>} : memref<76x640xf32, #tpu.memory_space<vmem>>, vector<4x320xf32>,
    %c1_227 = arith.constant 1 : index
    %c0_228 = arith.constant 0 : index
    %c84_229 = arith.constant 84 : index
    %145 = vector.load %arg7[%c1_227, %c0_228, %c84_229] : memref<2x4x420xf32, #tpu.memory_space<vmem>>, vector<1x4x320xf32>
    %146 = vector.shape_cast %145 : vector<1x4x320xf32> to vector<4x320xf32>
    %c72_230 = arith.constant 72 : index
    %c320_231 = arith.constant 320 : index
    %147 = vector.load %arg8[%c72_230, %c320_231] : memref<76x640xf32, #tpu.memory_space<vmem>>, vector<4x320xf32>
    tpu.vector_store %arg8[%c72_230, %c320_231], %146 {strides = array<i32>} : memref<76x640xf32, #tpu.memory_space<vmem>>, vector<4x320xf32>,
    %c0_232 = arith.constant 0 : index
    %c0_233 = arith.constant 0 : index
    %148 = vector.load %arg2[%c0_232, %c0_233] : memref<8x76xf32, #tpu.memory_space<vmem>>, vector<8x76xf32>
    %c0_234 = arith.constant 0 : index
    %c0_235 = arith.constant 0 : index
    %149 = vector.load %arg8[%c0_234, %c0_235] : memref<76x640xf32, #tpu.memory_space<vmem>>, vector<76x640xf32>
    %cst_236 = arith.constant dense<0.000000e+00> : vector<8x640xf32>
    %150 = tpu.matmul %148, %149, %cst_236 {dimension_numbers = #tpu.dot_dimension_numbers<[1], [0], [0], [1], [0, 0, 1, 1], [], []>} : vector<8x76xf32>, vector<76x640xf32>, vector<8x640xf32> -> vector<8x640xf32>
    %c0_237 = arith.constant 0 : index
    %c0_238 = arith.constant 0 : index
    %151 = vector.load %arg3[%c0_237, %c0_238] : memref<1x640xf32, #tpu.memory_space<vmem>>, vector<1x640xf32>
    %152 = vector.broadcast %151 : vector<1x640xf32> to vector<8x640xf32>
    %153 = arith.mulf %150, %152 : vector<8x640xf32>
    %cst_239 = arith.constant dense<0.000000e+00> : vector<8xf32>
    %154 = vector.multi_reduction <add>, %153, %cst_239 [1] : vector<8x640xf32> to vector<8xf32>
    %155 = vector.shape_cast %154 : vector<8xf32> to vector<8x1xf32>
    %cst_240 = arith.constant 5.120000e+02 : f32
    %156 = vector.broadcast %cst_240 : f32 to vector<8x1xf32>
    %157 = arith.divf %155, %156 : vector<8x1xf32>
    %158 = vector.broadcast %157 : vector<8x1xf32> to vector<8x640xf32>
    %159 = arith.subf %150, %158 : vector<8x640xf32>
    %160 = vector.broadcast %151 : vector<1x640xf32> to vector<8x640xf32>
    %161 = arith.mulf %159, %160 : vector<8x640xf32>
    %162 = arith.mulf %161, %161 : vector<8x640xf32>
    %cst_241 = arith.constant dense<0.000000e+00> : vector<8xf32>
    %163 = vector.multi_reduction <add>, %162, %cst_241 [1] : vector<8x640xf32> to vector<8xf32>
    %164 = vector.shape_cast %163 : vector<8xf32> to vector<8x1xf32>
    %cst_242 = arith.constant 5.120000e+02 : f32
    %165 = vector.broadcast %cst_242 : f32 to vector<8x1xf32>
    %166 = arith.divf %164, %165 : vector<8x1xf32>
    %c0_243 = arith.constant 0 : index
    %c0_244 = arith.constant 0 : index
    %167 = vector.load %arg4[%c0_243, %c0_244] : memref<8x1xf32, #tpu.memory_space<vmem>>, vector<8x1xf32>
    %cst_245 = arith.constant 9.99999974E-6 : f32
    %168 = vector.broadcast %cst_245 : f32 to vector<8x1xf32>
    %169 = arith.addf %166, %168 : vector<8x1xf32>
    %170 = math.rsqrt %169 : vector<8x1xf32>
    %171 = arith.mulf %167, %170 : vector<8x1xf32>
    %c0_246 = arith.constant 0 : index
    %c0_247 = arith.constant 0 : index
    %172 = vector.load %arg5[%c0_246, %c0_247] : memref<8x1xf32, #tpu.memory_space<vmem>>, vector<8x1xf32>
    %173 = arith.mulf %157, %171 : vector<8x1xf32>
    %174 = arith.subf %172, %173 : vector<8x1xf32>
    %175 = vector.broadcast %171 : vector<8x1xf32> to vector<8x640xf32>
    %176 = arith.mulf %150, %175 : vector<8x640xf32>
    %177 = vector.broadcast %174 : vector<8x1xf32> to vector<8x640xf32>
    %178 = arith.addf %176, %177 : vector<8x640xf32>
    %c0_248 = arith.constant 0 : index
    %c0_249 = arith.constant 0 : index
    %179 = vector.load %arg6[%c0_248, %c0_249] : memref<8x640xf32, #tpu.memory_space<vmem>>, vector<8x640xf32>
    tpu.vector_store %arg6[%c0_248, %c0_249], %178 {strides = array<i32>} : memref<8x640xf32, #tpu.memory_space<vmem>>, vector<8x640xf32>,
    return
  }
  func.func @transform_0(%arg0: i32) -> (i32, i32, i32) {
    %c0_i32 = arith.constant 0 : i32
    %c0_i32_0 = arith.constant 0 : i32
    %c0_i32_1 = arith.constant 0 : i32
    %c0_i32_2 = arith.constant 0 : i32
    return %c0_i32, %c0_i32_0, %c0_i32_1 : i32, i32, i32
  }
  func.func @transform_1(%arg0: i32) -> (i32, i32) {
    %c0_i32 = arith.constant 0 : i32
    %c0_i32_0 = arith.constant 0 : i32
    %c0_i32_1 = arith.constant 0 : i32
    return %c0_i32, %c0_i32_0 : i32, i32
  }
  func.func @transform_2(%arg0: i32) -> (i32, i32) {
    %c0_i32 = arith.constant 0 : i32
    %c0_i32_0 = arith.constant 0 : i32
    %c0_i32_1 = arith.constant 0 : i32
    return %c0_i32, %c0_i32_0 : i32, i32
  }
  func.func @transform_3(%arg0: i32) -> (i32, i32) {
    %c0_i32 = arith.constant 0 : i32
    %c0_i32_0 = arith.constant 0 : i32
    %c0_i32_1 = arith.constant 0 : i32
    return %c0_i32, %c0_i32_0 : i32, i32
  }
  func.func @transform_4(%arg0: i32) -> (i32, i32) {
    %c0_i32 = arith.constant 0 : i32
    %c0_i32_0 = arith.constant 0 : i32
    %c0_i32_1 = arith.constant 0 : i32
    return %c0_i32, %c0_i32_0 : i32, i32
  }
  func.func @transform_5(%arg0: i32) -> (i32, i32) {
    %c0_i32 = arith.constant 0 : i32
    %c0_i32_0 = arith.constant 0 : i32
    %c0_i32_1 = arith.constant 0 : i32
    return %c0_i32, %c0_i32_0 : i32, i32
  }
}

</mosaic_0001>

<bundles_post_ra>
// kernel: feature_fuse_forward.1
= control target key start
LH: loop header
LB: loop body
LE: loop exit
PB: predicated region body
PF: predicated region fallthrough
CT: control target
= control target key end

     0   :  { %s1564_s22 = smov 58   ;;  %s1565_s23 = smov 42   ;;  %v1580_v32 = vmov 0.0   ;;  %vm21_vm0 = vcmask 1043456   ;;  %vm22_vm1 = vcmask 293892   ;;  %vm37_vm3 = vcmask 470352   ;;  %s2211_s0 = inlined_call_operand.vmem [shape: f32[2,4,256], index: 0, kind: input, shape index: {}]   ;;  %s2212_s1 = inlined_call_operand.vmem [shape: f32[8,76], index: 1, kind: input, shape index: {}]   ;;  %s2213_s2 = inlined_call_operand.vmem [shape: f32[1,640], index: 2, kind: input, shape index: {}]   ;;  %s2214_s3 = inlined_call_operand.vmem [shape: f32[8,1], index: 3, kind: input, shape index: {}]   ;;  %s2215_s4 = inlined_call_operand.vmem [shape: f32[8,1], index: 4, kind: input, shape index: {}]   ;;  %s2216_s5 = inlined_call_operand.vmem [shape: f32[8,640], index: 5, kind: output, shape index: {}]  }
   0x1   :  { %v79_v0 = vld [vmem:[%s2211_s0] sm:$0xf]  ;;  %s1566_s26 = smov 54   ;;  %s1567_s6 = smov 50   ;;  %v164_v8 = vld [vmem:[%s2211_s0 + $0x4] sm:$0xf]  ;;  %vm23_vm2 = vmor %vm22_vm1, %vm21_vm0 }
   0x2   :  { %v27_v1 = vld [vmem:[%s2211_s0] sm:$0xf]  ;;  %83 = vrot.lane.b32.xlu1 %v79_v0, %s1564_s22  ;;  %s1568_s7 = smov 46   ;;  %s1569_s10 = smov 62   ;;  %v138_v9 = vld [vmem:[%s2211_s0 + $0x4] sm:$0xf] }
   0x3   :  { %31 = vrot.lane.b32.xlu0 %v27_v1, %s1565_s23  ;;  %v66_v2 = vld [vmem:[%s2211_s0] sm:$0xf]  ;;  %s1570_s15 = smov 70   ;;  %s1571_s16 = smov 66   ;;  %v28_v10 = vld [vmem:[%s2211_s0 + $0x8] sm:$0xf] }
   0x4   :  { %70 = vrot.lane.b32.xlu2 %v66_v2, %s1566_s26  ;;  %v53_v3 = vld [vmem:[%s2211_s0] sm:$0xf]  ;;  %s1572_s19 = smov 82   ;;  %s1573_s27 = smov 74   ;;  %v41_v11 = vld [vmem:[%s2211_s0 + $0x8] sm:$0xf] }
   0x5   :  { %v40_v4 = vld [vmem:[%s2211_s0] sm:$0xf]  ;;  %v151_v12 = vld [vmem:[%s2211_s0 + $0x4] sm:$0xf]  ;;  %v80_v13 = vld [vmem:[%s2211_s0 + $0x8] sm:$0xf] }
   0x6   :  { %v99_v5 = vld [vmem:[%s2211_s0] sm:$0xf]  ;;  %s1574_s12 = smov 78   ;;  %v54_v14 = vld [vmem:[%s2211_s0 + $0x8] sm:$0xf]  ;;  %s1575_s24 = smov 86  }
   0x7   :  { %v125_v6 = vld [vmem:[%s2211_s0] sm:$0xf]  ;;  %v184_v15 = vld [vmem:[%s2211_s0 + $0x4] sm:$0xf]  ;;  %v67_v16 = vld [vmem:[%s2211_s0 + $0x8] sm:$0xf] }
   0x8   :  { %v112_v7 = vld [vmem:[%s2211_s0] sm:$0xf]  ;;  %v197_v17 = vld [vmem:[%s2211_s0 + $0x4] sm:$0xf]  ;;  %s1576_s28 = smov 90   ;;  %s1577_s9 = smov 94  }
   0x9   :  { %v210_v18 = vld [vmem:[%s2211_s0 + $0x4] sm:$0xf]  ;;  %v100_v19 = vld [vmem:[%s2211_s0 + $0x8] sm:$0xf]  ;;  %s1578_s20 = smov 98   ;;  %s1579_s8 = smov 102  }
   0xa   :  { %57 = vrot.lane.b32.xlu1 %v53_v3, %s1567_s6  ;;  %v113_v20 = vld [vmem:[%s2211_s0 + $0x8] sm:$0xf]  ;;  %v223_v22 = vld [vmem:[%s2211_s0 + $0x4] sm:$0xf]  ;;  %v165_v23 = vld [vmem:[%s2211_s0 + $0xc] sm:$0xf] }
   0xb   :  { %44 = vrot.lane.b32.xlu0 %v40_v4, %s1568_s7  ;;  %v126_v21 = vld [vmem:[%s2211_s0 + $0x8] sm:$0xf]  ;;  %v139_v24 = vld [vmem:[%s2211_s0 + $0xc] sm:$0xf]  ;;  %v236_v25 = vld [vmem:[%s2211_s0 + $0x4] sm:$0xf] }
   0xc   :  { %103 = vrot.lane.b32.xlu2 %v99_v5, %s1569_s10  ;;  %v152_v26 = vld [vmem:[%s2211_s0 + $0xc] sm:$0xf]  ;;  %20 = vst [vmem:[#allocation2] sm:$0xff] %v1580_v32  ;;  %vm50_vm4 = vcmask 634352   ;;  %vm94_vm5 = vcmask 1044432   ;;  %vm95_vm6 = vcmask 80900  }
   0xd   :  { %v185_v27 = vld [vmem:[%s2211_s0 + $0xc] sm:$0xf]  ;;  %25 = vst [vmem:[#allocation2 + $0x10] sm:$0xff] %v1580_v32  ;;  %vm63_vm7 = vcmask 798352   ;;  %vm89_vm8 = vcmask 474112   ;;  %vm76_vm9 = vcmask 962352   ;;  %vm1761_vm10 = vmor %vm95_vm6, %vm94_vm5 }
   0xe   :  { %v198_v28 = vld [vmem:[%s2211_s0 + $0xc] sm:$0xf]  ;;  %24 = vst.msk [vmem:[#allocation2 + $0x8] sm:$0xff] %vm23_vm2, %v1580_v32  ;;  %vm109_vm11 = vcmask 240752   ;;  %vm122_vm12 = vcmask 404752   ;;  %vm135_vm13 = vcmask 568752  }
   0xf   :  { %v211_v29 = vld [vmem:[%s2211_s0 + $0xc] sm:$0xf]  ;;  %26 = vst.msk [vmem:[#allocation2 + $0x18] sm:$0xff] %vm23_vm2, %v1580_v32  ;;  %vm148_vm14 = vcmask 732752   ;;  %vm179_vm15 = vcmask 1044368   ;;  %vm180_vm1 = vcmask 15364  }
  0x10   :  { %v224_v30 = vld [vmem:[%s2211_s0 + $0xc] sm:$0xf]  ;;  %vm174_vm2 = vcmask 670720   ;;  %vm161_vm5 = vcmask 896752   ;;  %vm1778_vm6 = vmor %vm180_vm1, %vm179_vm15  ;;  %s1587_s29 = smov 87   ;;  %s1588_s30 = smov 23  }
  0x11   :  { %v237_v31 = vld [vmem:[%s2211_s0 + $0xc] sm:$0xf]  ;;  %s1581_s0 = smov 22   ;;  %s1591_s11 = smov 67   ;;  %vm372_vm15 = vcmask 867328   ;;  %vm352_vm1 = vcmask 1048068  }
  0x12   :  { %129 = vrot.lane.b32.xlu1 %v125_v6, %s1570_s15  ;;  %s1594_s13 = smov 65   ;;  %s1596_s14 = smov 64  }
  0x13   :  { %116 = vrot.lane.b32.xlu0 %v112_v7, %s1571_s16  ;;  %s1598_s17 = smov 124   ;;  %s1599_s18 = smov 60  }
  0x14   :  { %168 = vrot.lane.b32.xlu2 %v164_v8, %s1572_s19  ;;  %s1601_s21 = smov 24   ;;  %s1603_s25 = smov 20  }
  0x1a   :  { %142 = vrot.lane.b32.xlu1 %v138_v9, %s1573_s27 }
  0x1b   :  { %33 = vrot.lane.b32.xlu0 %v28_v10, %s1565_s23 }
  0x1c   :  { %46 = vrot.lane.b32.xlu2 %v41_v11, %s1568_s7 }
  0x22   :  { %155 = vrot.lane.b32.xlu1 %v151_v12, %s1574_s12 }
  0x23   :  { %85 = vrot.lane.b32.xlu0 %v80_v13, %s1564_s22  ;;  %s1585_s22 = smov 105  }
  0x24   :  { %59 = vrot.lane.b32.xlu2 %v54_v14, %s1567_s6  ;;  %s1586_s6 = smov 41  }
  0x2a   :  { %188 = vrot.lane.b32.xlu1 %v184_v15, %s1575_s24 }
  0x2b   :  { %72 = vrot.lane.b32.xlu0 %v67_v16, %s1566_s26  ;;  %s1592_s26 = smov 3  }
  0x2c   :  { %201 = vrot.lane.b32.xlu2 %v197_v17, %s1576_s28 }
  0x32   :  { %214 = vrot.lane.b32.xlu1 %v210_v18, %s1577_s9 }
  0x33   :  { %105 = vrot.lane.b32.xlu0 %v100_v19, %s1569_s10 }
  0x34   :  { %118 = vrot.lane.b32.xlu2 %v113_v20, %s1571_s16 }
  0x3a   :  { %131 = vrot.lane.b32.xlu1 %v126_v21, %s1570_s15  ;;  %s1590_s15 = smov 21  }
  0x3b   :  { %227 = vrot.lane.b32.xlu0 %v223_v22, %s1578_s20 }
  0x3c   :  { %170 = vrot.lane.b32.xlu2 %v165_v23, %s1572_s19  ;;  %s1593_s19 = smov 2  }
  0x42   :  { %144 = vrot.lane.b32.xlu1 %v139_v24, %s1573_s27  ;;  %s1597_s27 = smov 126  }
  0x43   :  { %240 = vrot.lane.b32.xlu0 %v236_v25, %s1579_s8 }
  0x44   :  { %157 = vrot.lane.b32.xlu2 %v152_v26, %s1574_s12  ;;  %s1602_s12 = smov 84  }
  0x4a   :  { %203 = vrot.lane.b32.xlu1 %v198_v28, %s1576_s28  ;;  %s1582_s28 = smov 107  }
  0x4b   :  { %190 = vrot.lane.b32.xlu0 %v185_v27, %s1575_s24 }
  0x4c   :  { %216 = vrot.lane.b32.xlu2 %v211_v29, %s1577_s9  ;;  %s1583_s9 = smov 106  }
  0x52   :  { %242 = vrot.lane.b32.xlu1 %v237_v31, %s1579_s8  ;;  %s1589_s8 = smov 85  }
  0x53   :  { %229 = vrot.lane.b32.xlu0 %v224_v30, %s1578_s20  ;;  %s1584_s20 = smov 43  }
  0x5e   :  { %v71_v33 = vpop.permute.xlu2 %70 }
  0x66   :  { %v104_v34 = vpop.permute.xlu2 %103 }
  0x6e   :  { %v169_v37 = vpop.permute.xlu2 %168 }
  0x6f   :  { %v172_v49 = vrot.slane %v169_v37, 4 }
  0x71   :  { %v175_v53 = vsel %vm174_vm2, %v172_v49, %v169_v37 }
  0x74   :  { %v84_v35 = vpop.permute.xlu1 %83 }
  0x75   :  { %v32_v36 = vpop.permute.xlu0 %31  ;;  %v87_v38 = vrot.slane %v84_v35, 4 }
  0x76   :  { %38 = vst.msk [vmem:[#allocation2] sm:$0xf] %vm37_vm3, %v32_v36  ;;  %v47_v43 = vpop.permute.xlu2 %46 }
  0x77   :  { %v90_v42 = vsel %vm89_vm8, %v87_v38, %v84_v35 }
  0x7c   :  { %v58_v39 = vpop.permute.xlu1 %57 }
  0x7d   :  { %v45_v40 = vpop.permute.xlu0 %44 }
  0x7e   :  { %51 = vst.msk [vmem:[#allocation2] sm:$0xf] %vm50_vm4, %v45_v40  ;;  %v60_v46 = vpop.permute.xlu2 %59 }
  0x7f   :  { %64 = vst.msk [vmem:[#allocation2] sm:$0xf] %vm63_vm7, %v58_v39 }
  0x80   :  { %77 = vst.msk [vmem:[#allocation2] sm:$0xf] %vm76_vm9, %v71_v33 }
  0x81   :  { %97 = vst.msk [vmem:[#allocation2] sm:$0xff] %vm1761_vm10, %v90_v42 }
  0x82   :  { %110 = vst.msk [vmem:[#allocation2 + $0x4] sm:$0xf] %vm109_vm11, %v104_v34 }
  0x84   :  { %v130_v44 = vpop.permute.xlu1 %129 }
  0x85   :  { %v117_v45 = vpop.permute.xlu0 %116 }
  0x86   :  { %123 = vst.msk [vmem:[#allocation2 + $0x4] sm:$0xf] %vm122_vm12, %v117_v45  ;;  %v202_v54 = vpop.permute.xlu2 %201 }
  0x87   :  { %136 = vst.msk [vmem:[#allocation2 + $0x4] sm:$0xf] %vm135_vm13, %v130_v44 }
  0x8c   :  { %v143_v47 = vpop.permute.xlu1 %142 }
  0x8d   :  { %v34_v48 = vpop.permute.xlu0 %33  ;;  %149 = vst.msk [vmem:[#allocation2 + $0x4] sm:$0xf] %vm148_vm14, %v143_v47 }
  0x8e   :  { %39 = vst.msk [vmem:[#allocation2 + $0x10] sm:$0xf] %vm37_vm3, %v34_v48  ;;  %vm194_vm3 = vcmask 175152   ;;  %v119_v60 = vpop.permute.xlu2 %118 }
  0x8f   :  { %52 = vst.msk [vmem:[#allocation2 + $0x10] sm:$0xf] %vm50_vm4, %v47_v43  ;;  %vm207_vm4 = vcmask 339152  }
  0x90   :  { %65 = vst.msk [vmem:[#allocation2 + $0x10] sm:$0xf] %vm63_vm7, %v60_v46  ;;  %vm220_vm7 = vcmask 503152  }
  0x94   :  { %v156_v51 = vpop.permute.xlu1 %155 }
  0x95   :  { %v86_v52 = vpop.permute.xlu0 %85  ;;  %162 = vst.msk [vmem:[#allocation2 + $0x4] sm:$0xf] %vm161_vm5, %v156_v51 }
  0x96   :  { %182 = vst.msk [vmem:[#allocation2 + $0x4] sm:$0xff] %vm1778_vm6, %v175_v53  ;;  %v88_v55 = vrot.slane %v86_v52, 4  ;;  %v171_v1 = vpop.permute.xlu2 %170 }
  0x97   :  { %v173_v4 = vrot.slane %v171_v1, 4 }
  0x98   :  { %v91_v59 = vsel %vm89_vm8, %v88_v55, %v86_v52  ;;  %vm233_vm8 = vcmask 667152  }
  0x99   :  { %v176_v8 = vsel %vm174_vm2, %v173_v4, %v171_v1  ;;  %vm423_vm2 = vcmask 859136  }
  0x9c   :  { %v189_v56 = vpop.permute.xlu1 %188 }
  0x9d   :  { %v73_v57 = vpop.permute.xlu0 %72  ;;  %v1786_v58 = vld [vmem:[#allocation2] sm:$0xff]  ;;  %195 = vst.msk [vmem:[#allocation2 + $0x8] sm:$0xf] %vm194_vm3, %v189_v56 }
  0x9e   :  { %253 = vst [vmem:[#allocation1] ss:$2 sm:$0xff] %v1786_v58  ;;  %v158_v5 = vpop.permute.xlu2 %157 }
  0x9f   :  { %78 = vst.msk [vmem:[#allocation2 + $0x10] sm:$0xf] %vm76_vm9, %v73_v57  ;;  %vm246_vm9 = vcmask 831152  }
  0xa0   :  { %98 = vst.msk [vmem:[#allocation2 + $0x10] sm:$0xff] %vm1761_vm10, %v91_v59  ;;  %vm265_vm10 = vcmask 703488  }
  0xa1   :  { %208 = vst.msk [vmem:[#allocation2 + $0x8] sm:$0xf] %vm207_vm4, %v202_v54 }
  0xa4   :  { %v215_v61 = vpop.permute.xlu1 %214 }
  0xa5   :  { %v106_v62 = vpop.permute.xlu0 %105  ;;  %v256_v63 = vld.sshfl [vmem:[#allocation1] sm:$0xff pattern:$0x75316420]  ;;  %v257_v0 = vld.sshfl [vmem:[#allocation1 + $0x8] sm:$0xff pattern:$0x75316420] }
  0xa6   :  { %221 = vst.msk [vmem:[#allocation2 + $0x8] sm:$0xf] %vm220_vm7, %v215_v61  ;;  %261 = vrot.lane.b32.xlu0 %v257_v0, %s1575_s24  ;;  %259 = vrot.lane.b32.xlu2 %v256_v63, %s1575_s24  ;;  %v217_v13 = vpop.permute.xlu2 %216 }
  0xa7   :  { %111 = vst.msk [vmem:[#allocation2 + $0x14] sm:$0xf] %vm109_vm11, %v106_v62  ;;  %vm273_vm11 = vcmask 519168  }
  0xa8   :  { %124 = vst.msk [vmem:[#allocation2 + $0x14] sm:$0xf] %vm122_vm12, %v119_v60  ;;  %vm298_vm12 = vcmask 1043968  }
  0xac   :  { %v132_v2 = vpop.permute.xlu1 %131 }
  0xad   :  { %v228_v3 = vpop.permute.xlu0 %227  ;;  %137 = vst.msk [vmem:[#allocation2 + $0x14] sm:$0xf] %vm135_vm13, %v132_v2  ;;  %vm2217_vm13 = vcmask 179200  }
  0xae   :  { %234 = vst.msk [vmem:[#allocation2 + $0x8] sm:$0xf] %vm233_vm8, %v228_v3 }
  0xb4   :  { %v145_v6 = vpop.permute.xlu1 %144 }
  0xb5   :  { %v241_v7 = vpop.permute.xlu0 %240  ;;  %150 = vst.msk [vmem:[#allocation2 + $0x14] sm:$0xf] %vm148_vm14, %v145_v6  ;;  %vm327_vm14 = vcmask 523268  }
  0xb6   :  { %247 = vst.msk [vmem:[#allocation2 + $0x8] sm:$0xf] %vm246_vm9, %v241_v7 }
  0xb7   :  { %163 = vst.msk [vmem:[#allocation2 + $0x14] sm:$0xf] %vm161_vm5, %v158_v5  ;;  %vm397_vm5 = vcmask 343040  }
  0xb8   :  { %183 = vst.msk [vmem:[#allocation2 + $0x14] sm:$0xff] %vm1778_vm6, %v176_v8  ;;  %vm449_vm6 = vcmask 334848  }
  0xbc   :  { %v204_v10 = vpop.permute.xlu1 %203 }
  0xbd   :  { %v191_v9 = vpop.permute.xlu0 %190  ;;  %v250_v11 = vld [vmem:[#allocation2 + $0x8] sm:$0xf] }
  0xbe   :  { %255 = vst [vmem:[#allocation1 + $0x10] ss:$2 sm:$0xff] %v250_v11  ;;  %v303_v22 = vld [vmem:[#allocation2 + $0x8] sm:$0xf] }
  0xbf   :  { %v1808_v12 = vld [vmem:[#allocation2 + $0x10] sm:$0xff]  ;;  %196 = vst.msk [vmem:[#allocation2 + $0x18] sm:$0xf] %vm194_vm3, %v191_v9  ;;  %v357_v30 = vld [vmem:[#allocation2 + $0x8] sm:$0xf]  ;;  %vm474_vm3 = vcmask 711680  }
  0xc0   :  { %280 = vst [vmem:[#allocation1] ss:$2 sm:$0xff] %v1808_v12  ;;  %v407_v38 = vld [vmem:[#allocation2 + $0x8] sm:$0xf] }
  0xc1   :  { %209 = vst.msk [vmem:[#allocation2 + $0x18] sm:$0xf] %vm207_vm4, %v204_v10  ;;  %v459_v46 = vld [vmem:[#allocation2 + $0x8] sm:$0xf]  ;;  %vm499_vm4 = vcmask 187392  }
  0xc2   :  { %222 = vst.msk [vmem:[#allocation2 + $0x18] sm:$0xf] %vm220_vm7, %v217_v13  ;;  %v509_v54 = vld [vmem:[#allocation2 + $0x8] sm:$0xf]  ;;  %vm574_vm7 = vcmask 695296  }
  0xc3   :  { %v559_v2 = vld [vmem:[#allocation2 + $0x8] sm:$0xf] }
  0xc4   :  { %v243_v16 = vpop.permute.xlu1 %242  ;;  %v609_v10 = vld [vmem:[#allocation2 + $0x8] sm:$0xf] }
  0xc5   :  { %v230_v14 = vpop.permute.xlu0 %229  ;;  %v258_v15 = vld.sshfl [vmem:[#allocation1 + $0x10] sm:$0xff pattern:$0x75316420] }
  0xc6   :  { %263 = vrot.lane.b32.xlu1 %v258_v15, %s1575_s24  ;;  %235 = vst.msk [vmem:[#allocation2 + $0x18] sm:$0xf] %vm233_vm8, %v230_v14  ;;  %vm599_vm8 = vcmask 171008  }
  0xc7   :  { %248 = vst.msk [vmem:[#allocation2 + $0x18] sm:$0xf] %vm246_vm9, %v243_v16  ;;  %v283_v17 = vld.sshfl [vmem:[#allocation1] sm:$0xff pattern:$0x75316420]  ;;  %vm625_vm9 = vcmask 547840  }
  0xc8   :  { %v284_v18 = vld.sshfl [vmem:[#allocation1 + $0x8] sm:$0xff pattern:$0x75316420]  ;;  %286 = vrot.lane.b32.xlu2 %v283_v17, %s1581_s0 }
  0xc9   :  { %307 = vst [vmem:[#allocation1 + $0x1] ss:$2 sm:$0xff] %v1786_v58  ;;  %288 = vrot.lane.b32.xlu0 %v284_v18, %s1581_s0 }
  0xce   :  { %v277_v19 = vld [vmem:[#allocation2 + $0x18] sm:$0xf] }
  0xcf   :  { %282 = vst [vmem:[#allocation1 + $0x10] ss:$2 sm:$0xff] %v277_v19  ;;  %v330_v27 = vld [vmem:[#allocation2 + $0x18] sm:$0xf] }
  0xd0   :  { %v310_v20 = vld.sshfl [vmem:[#allocation1] sm:$0xff pattern:$0x75316420]  ;;  %v1820_v21 = vld.sshfl [vmem:[#allocation1 + $0x8] sm:$0xff pattern:$0x75316420] }
  0xd1   :  { %334 = vst [vmem:[#allocation1 + $0x1] ss:$2 sm:$0xff] %v1808_v12  ;;  %313 = vrot.lane.b32.xlu1 %v310_v20, %s1582_s28  ;;  %v382_v35 = vld [vmem:[#allocation2 + $0x18] sm:$0xf] }
  0xd2   :  { %v433_v43 = vld [vmem:[#allocation2 + $0x18] sm:$0xf] }
  0xd3   :  { %v484_v51 = vld [vmem:[#allocation2 + $0x18] sm:$0xf] }
  0xd4   :  { %v534_v63 = vld [vmem:[#allocation2 + $0x18] sm:$0xf] }
  0xd5   :  { %v584_v7 = vld [vmem:[#allocation2 + $0x18] sm:$0xf] }
  0xd6   :  { %v1824_v23 = vld.sshfl [vmem:[#allocation1 + $0x10] sm:$0xff pattern:$0x75316420]  ;;  %v635_v20 = vld [vmem:[#allocation2 + $0x18] sm:$0xf] }
  0xd7   :  { %309 = vst [vmem:[#allocation1 + $0x11] ss:$2 sm:$0xff] %v303_v22 }
  0xd8   :  { %v337_v24 = vld.sshfl [vmem:[#allocation1] sm:$0xff pattern:$0x75316420]  ;;  %v1826_v25 = vld.sshfl [vmem:[#allocation1 + $0x8] sm:$0xff pattern:$0x75316420] }
  0xd9   :  { %360 = vst [vmem:[#allocation1] ss:$2 sm:$0xff] %v1786_v58 }
  0xde   :  { %v312_v26 = vld.sshfl [vmem:[#allocation1 + $0x10] sm:$0xff pattern:$0x75316420] }
  0xdf   :  { %336 = vst [vmem:[#allocation1 + $0x11] ss:$2 sm:$0xff] %v330_v27  ;;  %317 = vrot.lane.b32.xlu0 %v312_v26, %s1582_s28  ;;  %v661_v27 = vld [vmem:[#allocation2 + $0x8] sm:$0xf] }
  0xe0   :  { %v363_v28 = vld.sshfl [vmem:[#allocation1] sm:$0xff pattern:$0x75316420]  ;;  %v364_v29 = vld.sshfl [vmem:[#allocation1 + $0x8] sm:$0xff pattern:$0x75316420] }
  0xe1   :  { %385 = vst [vmem:[#allocation1] ss:$2 sm:$0xff] %v1808_v12  ;;  %368 = vrot.lane.b32.xlu2 %v364_v29, %s1583_s9  ;;  %366 = vrot.lane.b32.xlu1 %v363_v28, %s1583_s9 }
  0xe6   :  { %v1831_v31 = vld.sshfl [vmem:[#allocation1 + $0x10] sm:$0xff pattern:$0x75316420] }
  0xe7   :  { %362 = vst [vmem:[#allocation1 + $0x10] ss:$2 sm:$0xff] %v357_v30  ;;  %340 = vrot.lane.b32.xlu0 %v337_v24, %s1584_s20 }
  0xe8   :  { %v388_v32 = vld.sshfl [vmem:[#allocation1] sm:$0xff pattern:$0x75316420]  ;;  %v389_v33 = vld.sshfl [vmem:[#allocation1 + $0x8] sm:$0xff pattern:$0x75316420] }
  0xe9   :  { %411 = vst [vmem:[#allocation1 + $0x1] ss:$2 sm:$0xff] %v1786_v58  ;;  %391 = vrot.lane.b32.xlu1 %v388_v32, %s1565_s23 }
  0xee   :  { %v365_v34 = vld.sshfl [vmem:[#allocation1 + $0x10] sm:$0xff pattern:$0x75316420] }
  0xef   :  { %387 = vst [vmem:[#allocation1 + $0x10] ss:$2 sm:$0xff] %v382_v35  ;;  %370 = vrot.lane.b32.xlu0 %v365_v34, %s1583_s9  ;;  %v686_v34 = vld [vmem:[#allocation2 + $0x18] sm:$0xf]  ;;  %s1605_s9 = smov 112  }
  0xf0   :  { %v414_v36 = vld.sshfl [vmem:[#allocation1] sm:$0xff pattern:$0x75316420]  ;;  %v415_v37 = vld.sshfl [vmem:[#allocation1 + $0x8] sm:$0xff pattern:$0x75316420] }
  0xf1   :  { %437 = vst [vmem:[#allocation1 + $0x1] ss:$2 sm:$0xff] %v1808_v12  ;;  %419 = vrot.lane.b32.xlu2 %v415_v37, %s1585_s22  ;;  %417 = vrot.lane.b32.xlu1 %v414_v36, %s1585_s22 }
  0xf6   :  { %v1837_v39 = vld.sshfl [vmem:[#allocation1 + $0x10] sm:$0xff pattern:$0x75316420] }
  0xf7   :  { %413 = vst [vmem:[#allocation1 + $0x11] ss:$2 sm:$0xff] %v407_v38  ;;  %393 = vrot.lane.b32.xlu0 %v389_v33, %s1565_s23 }
  0xf8   :  { %v440_v40 = vld.sshfl [vmem:[#allocation1] sm:$0xff pattern:$0x75316420]  ;;  %v441_v41 = vld.sshfl [vmem:[#allocation1 + $0x8] sm:$0xff pattern:$0x75316420] }
  0xf9   :  { %462 = vst [vmem:[#allocation1] ss:$2 sm:$0xff] %v1786_v58  ;;  %443 = vrot.lane.b32.xlu2 %v440_v40, %s1586_s6 }
  0xfe   :  { %v416_v42 = vld.sshfl [vmem:[#allocation1 + $0x10] sm:$0xff pattern:$0x75316420] }
  0xff   :  { %439 = vst [vmem:[#allocation1 + $0x11] ss:$2 sm:$0xff] %v433_v43  ;;  %445 = vrot.lane.b32.xlu0 %v441_v41, %s1586_s6  ;;  %421 = vrot.lane.b32.xlu1 %v416_v42, %s1585_s22  ;;  %v711_v41 = vld [vmem:[#allocation2 + $0x8] sm:$0xf]  ;;  %s1606_s22 = smov 44  }
 0x100   :  { %v465_v44 = vld.sshfl [vmem:[#allocation1] sm:$0xff pattern:$0x75316420]  ;;  %v466_v45 = vld.sshfl [vmem:[#allocation1 + $0x8] sm:$0xff pattern:$0x75316420]  ;;  %v260_v56 = vpop.permute.xlu2 %259 }
 0x101   :  { %487 = vst [vmem:[#allocation1] ss:$2 sm:$0xff] %v1808_v12  ;;  %468 = vrot.lane.b32.xlu2 %v465_v44, %s1587_s29 }
 0x106   :  { %v1844_v47 = vld.sshfl [vmem:[#allocation1 + $0x10] sm:$0xff pattern:$0x75316420] }
 0x107   :  { %464 = vst [vmem:[#allocation1 + $0x10] ss:$2 sm:$0xff] %v459_v46  ;;  %470 = vrot.lane.b32.xlu0 %v466_v45, %s1587_s29 }
 0x108   :  { %v490_v48 = vld.sshfl [vmem:[#allocation1] sm:$0xff pattern:$0x75316420]  ;;  %v491_v49 = vld.sshfl [vmem:[#allocation1 + $0x8] sm:$0xff pattern:$0x75316420] }
 0x109   :  { %513 = vst [vmem:[#allocation1 + $0x1] ss:$2 sm:$0xff] %v1786_v58  ;;  %493 = vrot.lane.b32.xlu1 %v490_v48, %s1588_s30 }
 0x10e   :  { %v467_v50 = vld.sshfl [vmem:[#allocation1 + $0x10] sm:$0xff pattern:$0x75316420] }
 0x10f   :  { %489 = vst [vmem:[#allocation1 + $0x10] ss:$2 sm:$0xff] %v484_v51  ;;  %472 = vrot.lane.b32.xlu0 %v467_v50, %s1587_s29  ;;  %v737_v50 = vld [vmem:[#allocation2 + $0x18] sm:$0xf]  ;;  %s1607_s29 = smov 110  }
 0x110   :  { %v516_v52 = vld.sshfl [vmem:[#allocation1] sm:$0xff pattern:$0x75316420]  ;;  %v517_v53 = vld.sshfl [vmem:[#allocation1 + $0x8] sm:$0xff pattern:$0x75316420] }
 0x111   :  { %538 = vst [vmem:[#allocation1 + $0x1] ss:$2 sm:$0xff] %v1808_v12  ;;  %519 = vrot.lane.b32.xlu2 %v516_v52, %s1575_s24  ;;  %495 = vrot.lane.b32.xlu1 %v491_v49, %s1588_s30 }
 0x116   :  { %v1851_v55 = vld.sshfl [vmem:[#allocation1 + $0x10] sm:$0xff pattern:$0x75316420] }
 0x117   :  { %515 = vst [vmem:[#allocation1 + $0x11] ss:$2 sm:$0xff] %v509_v54  ;;  %521 = vrot.lane.b32.xlu0 %v517_v53, %s1575_s24 }
 0x118   :  { %v262_v57 = vpop.permute.xlu0 %261  ;;  %v541_v60 = vld.sshfl [vmem:[#allocation1] sm:$0xff pattern:$0x75316420]  ;;  %v542_v61 = vld.sshfl [vmem:[#allocation1 + $0x8] sm:$0xff pattern:$0x75316420] }
 0x119   :  { %v266_v59 = vsel %vm265_vm10, %v260_v56, %v262_v57  ;;  %562 = vst [vmem:[#allocation1] ss:$2 sm:$0xff] %v1786_v58  ;;  %544 = vrot.lane.b32.xlu2 %v541_v60, %s1581_s0  ;;  %v763_v56 = vld [vmem:[#allocation2 + $0x8] sm:$0xf] }
 0x11a   :  { %271 = vst [vmem:[#allocation3] sm:$0xf] %v266_v59 }
 0x11e   :  { %v518_v62 = vld.sshfl [vmem:[#allocation1 + $0x10] sm:$0xff pattern:$0x75316420] }
 0x11f   :  { %540 = vst [vmem:[#allocation1 + $0x11] ss:$2 sm:$0xff] %v534_v63  ;;  %523 = vrot.lane.b32.xlu1 %v518_v62, %s1575_s24 }
 0x120   :  { %v565_v0 = vld.sshfl [vmem:[#allocation1] sm:$0xff pattern:$0x75316420]  ;;  %v566_v1 = vld.sshfl [vmem:[#allocation1 + $0x8] sm:$0xff pattern:$0x75316420] }
 0x121   :  { %587 = vst [vmem:[#allocation1] ss:$2 sm:$0xff] %v1808_v12  ;;  %568 = vrot.lane.b32.xlu2 %v565_v0, %s1589_s8  ;;  %570 = vrot.lane.b32.xlu0 %v566_v1, %s1589_s8 }
 0x122   :  { %v287_v17 = vpop.permute.xlu2 %286 }
 0x126   :  { %v1859_v3 = vld.sshfl [vmem:[#allocation1 + $0x10] sm:$0xff pattern:$0x75316420] }
 0x127   :  { %564 = vst [vmem:[#allocation1 + $0x10] ss:$2 sm:$0xff] %v559_v2  ;;  %546 = vrot.lane.b32.xlu1 %v542_v61, %s1581_s0 }
 0x128   :  { %v590_v4 = vld.sshfl [vmem:[#allocation1] sm:$0xff pattern:$0x75316420]  ;;  %v591_v5 = vld.sshfl [vmem:[#allocation1 + $0x8] sm:$0xff pattern:$0x75316420] }
 0x129   :  { %613 = vst [vmem:[#allocation1 + $0x1] ss:$2 sm:$0xff] %v1786_v58 }
 0x12e   :  { %v567_v6 = vld.sshfl [vmem:[#allocation1 + $0x10] sm:$0xff pattern:$0x75316420] }
 0x12f   :  { %589 = vst [vmem:[#allocation1 + $0x10] ss:$2 sm:$0xff] %v584_v7  ;;  %593 = vrot.lane.b32.xlu1 %v590_v4, %s1590_s15  ;;  %572 = vrot.lane.b32.xlu0 %v567_v6, %s1589_s8  ;;  %v779_v4 = vld [vmem:[#allocation2 + $0x18] sm:$0xf]  ;;  %s1608_s8 = smov 108  }
 0x130   :  { %v616_v8 = vld.sshfl [vmem:[#allocation1] sm:$0xff pattern:$0x75316420]  ;;  %v617_v9 = vld.sshfl [vmem:[#allocation1 + $0x8] sm:$0xff pattern:$0x75316420] }
 0x131   :  { %639 = vst [vmem:[#allocation1 + $0x1] ss:$2 sm:$0xff] %v1808_v12  ;;  %619 = vrot.lane.b32.xlu2 %v616_v8, %s1591_s11 }
 0x136   :  { %v1865_v11 = vld.sshfl [vmem:[#allocation1 + $0x10] sm:$0xff pattern:$0x75316420] }
 0x137   :  { %615 = vst [vmem:[#allocation1 + $0x11] ss:$2 sm:$0xff] %v609_v10  ;;  %595 = vrot.lane.b32.xlu1 %v591_v5, %s1590_s15  ;;  %621 = vrot.lane.b32.xlu0 %v617_v9, %s1591_s11 }
 0x138   :  { %v264_v13 = vpop.permute.xlu1 %263  ;;  %v642_v15 = vld.sshfl [vmem:[#allocation1] sm:$0xff pattern:$0x75316420]  ;;  %v643_v16 = vld.sshfl [vmem:[#allocation1 + $0x8] sm:$0xff pattern:$0x75316420] }
 0x139   :  { %v267_v14 = vsel %vm265_vm10, %v262_v57, %v264_v13  ;;  %274 = vst.msk [vmem:[#allocation3 + $0x10] sm:$0xf] %vm273_vm11, %v264_v13  ;;  %645 = vrot.lane.b32.xlu2 %v642_v15, %s1592_s26  ;;  %v804_v13 = vld [vmem:[#allocation2 + $0x8] sm:$0xf] }
 0x13a   :  { %272 = vst [vmem:[#allocation3 + $0x8] sm:$0xf] %v267_v14 }
 0x13b   :  { %664 = vst [vmem:[#allocation1] ss:$2 sm:$0xff] %v1786_v58  ;;  %v1873_v18 = vpop.permute.xlu0 %288  ;;  %v369_v38 = vpop.permute.xlu2 %368 }
 0x13c   :  { %299 = vst.msk [vmem:[#allocation3 + $0x10] sm:$0xf] %vm298_vm12, %v287_v17  ;;  %v293_v22 = vsel %vm2217_vm13, %v287_v17, %v1873_v18 }
 0x13d   :  { %300 = vst [vmem:[#allocation3 + $0x18] sm:$0xf] %v293_v22 }
 0x13e   :  { %v618_v19 = vld.sshfl [vmem:[#allocation1 + $0x10] sm:$0xff pattern:$0x75316420] }
 0x13f   :  { %641 = vst [vmem:[#allocation1 + $0x11] ss:$2 sm:$0xff] %v635_v20  ;;  %623 = vrot.lane.b32.xlu1 %v618_v19, %s1591_s11 }
 0x142   :  { %v667_v24 = vld.sshfl [vmem:[#allocation1] sm:$0xff pattern:$0x75316420]  ;;  %v668_v26 = vld.sshfl [vmem:[#allocation1 + $0x8] sm:$0xff pattern:$0x75316420] }
 0x143   :  { %689 = vst [vmem:[#allocation1] ss:$2 sm:$0xff] %v1808_v12  ;;  %670 = vrot.lane.b32.xlu2 %v667_v24, %s1571_s16  ;;  %672 = vrot.lane.b32.xlu0 %v668_v26, %s1571_s16  ;;  %v1884_v32 = vpop.permute.xlu1 %313 }
 0x146   :  { %v1880_v28 = vld.sshfl [vmem:[#allocation1 + $0x10] sm:$0xff pattern:$0x75316420] }
 0x147   :  { %666 = vst [vmem:[#allocation1 + $0x10] ss:$2 sm:$0xff] %v661_v27  ;;  %647 = vrot.lane.b32.xlu1 %v643_v16, %s1592_s26  ;;  %v830_v27 = vld [vmem:[#allocation2 + $0x18] sm:$0xf] }
 0x14a   :  { %v692_v29 = vld.sshfl [vmem:[#allocation1] sm:$0xff pattern:$0x75316420]  ;;  %v693_v30 = vld.sshfl [vmem:[#allocation1 + $0x8] sm:$0xff pattern:$0x75316420] }
 0x14b   :  { %715 = vst [vmem:[#allocation1 + $0x1] ss:$2 sm:$0xff] %v1786_v58  ;;  %v420_v57 = vpop.permute.xlu2 %419 }
 0x14e   :  { %v669_v33 = vld.sshfl [vmem:[#allocation1 + $0x10] sm:$0xff pattern:$0x75316420] }
 0x14f   :  { %691 = vst [vmem:[#allocation1 + $0x10] ss:$2 sm:$0xff] %v686_v34  ;;  %695 = vrot.lane.b32.xlu1 %v692_v29, %s1593_s19  ;;  %674 = vrot.lane.b32.xlu0 %v669_v33, %s1571_s16  ;;  %s1595_s16 = smov 1  }
 0x151   :  { %v1888_v35 = vpop.permute.xlu0 %317 }
 0x152   :  { %v718_v36 = vld.sshfl [vmem:[#allocation1] sm:$0xff pattern:$0x75316420]  ;;  %v719_v37 = vld.sshfl [vmem:[#allocation1 + $0x8] sm:$0xff pattern:$0x75316420] }
 0x153   :  { %741 = vst [vmem:[#allocation1 + $0x1] ss:$2 sm:$0xff] %v1808_v12  ;;  %721 = vrot.lane.b32.xlu2 %v718_v36, %s1594_s13  ;;  %v367_v40 = vpop.permute.xlu1 %366  ;;  %v444_v5 = vpop.permute.xlu2 %443 }
 0x154   :  { %328 = vst.msk [vmem:[#allocation3 + $0x10] sm:$0xf0] %vm327_vm14, %v1888_v35  ;;  %v373_v43 = vsel %vm372_vm15, %v367_v40, %v369_v38 }
 0x155   :  { %378 = vst [vmem:[#allocation3 + $0x28] sm:$0xf] %v373_v43 }
 0x156   :  { %v1893_v42 = vld.sshfl [vmem:[#allocation1 + $0x10] sm:$0xff pattern:$0x75316420] }
 0x157   :  { %717 = vst [vmem:[#allocation1 + $0x11] ss:$2 sm:$0xff] %v711_v41  ;;  %697 = vrot.lane.b32.xlu1 %v693_v30, %s1593_s19  ;;  %723 = vrot.lane.b32.xlu0 %v719_v37, %s1594_s13  ;;  %v856_v37 = vld [vmem:[#allocation2 + $0x8] sm:$0xf] }
 0x159   :  { %v1897_v44 = vpop.permute.xlu0 %340 }
 0x15a   :  { %v744_v45 = vld.sshfl [vmem:[#allocation1] sm:$0xff pattern:$0x75316420]  ;;  %v745_v46 = vld.sshfl [vmem:[#allocation1 + $0x8] sm:$0xff pattern:$0x75316420] }
 0x15b   :  { %766 = vst [vmem:[#allocation1] ss:$2 sm:$0xff] %v1786_v58  ;;  %747 = vrot.lane.b32.xlu2 %v744_v45, %s1595_s16  ;;  %v392_v48 = vpop.permute.xlu1 %391  ;;  %v469_v16 = vpop.permute.xlu2 %468 }
 0x15c   :  { %353 = vst.msk [vmem:[#allocation3 + $0x10] sm:$0xf0] %vm352_vm1, %v1897_v44 }
 0x15e   :  { %v720_v49 = vld.sshfl [vmem:[#allocation1 + $0x10] sm:$0xff pattern:$0x75316420] }
 0x15f   :  { %743 = vst [vmem:[#allocation1 + $0x11] ss:$2 sm:$0xff] %v737_v50  ;;  %725 = vrot.lane.b32.xlu1 %v720_v49, %s1594_s13 }
 0x161   :  { %v371_v51 = vpop.permute.xlu0 %370 }
 0x162   :  { %v769_v52 = vld.sshfl [vmem:[#allocation1] sm:$0xff pattern:$0x75316420]  ;;  %v770_v53 = vld.sshfl [vmem:[#allocation1 + $0x8] sm:$0xff pattern:$0x75316420]  ;;  %v374_v54 = vsel %vm372_vm15, %v369_v38, %v371_v51 }
 0x163   :  { %782 = vst [vmem:[#allocation1] ss:$2 sm:$0xff] %v1808_v12  ;;  %v418_v60 = vpop.permute.xlu1 %417  ;;  %vm676_vm15 = vcmask 539648  }
 0x164   :  { %775 = vst [vmem:[#allocation3 + $0xc8] sm:$0xf] %v769_v52  ;;  %v424_v61 = vsel %vm423_vm2, %v418_v60, %v420_v57 }
 0x165   :  { %776 = vst [vmem:[#allocation3 + $0xd0] sm:$0xf] %v770_v53 }
 0x166   :  { %v1905_v59 = vld.sshfl [vmem:[#allocation1 + $0x10] sm:$0xff pattern:$0x75316420]  ;;  %379 = vst [vmem:[#allocation3 + $0x30] sm:$0xf] %v374_v54 }
 0x167   :  { %768 = vst [vmem:[#allocation1 + $0x10] ss:$2 sm:$0xff] %v763_v56  ;;  %749 = vrot.lane.b32.xlu1 %v745_v46, %s1595_s16 }
 0x168   :  { %380 = vst.msk [vmem:[#allocation3 + $0x38] sm:$0xf] %vm273_vm11, %v371_v51  ;;  %v881_v51 = vld [vmem:[#allocation2 + $0x18] sm:$0xf] }
 0x169   :  { %403 = vst.msk [vmem:[#allocation3 + $0x38] sm:$0xf] %vm298_vm12, %v392_v48  ;;  %v1911_v62 = vpop.permute.xlu0 %393 }
 0x16a   :  { %v785_v63 = vld.sshfl [vmem:[#allocation1] sm:$0xff pattern:$0x75316420]  ;;  %v786_v0 = vld.sshfl [vmem:[#allocation1 + $0x8] sm:$0xff pattern:$0x75316420]  ;;  %v398_v1 = vsel %vm397_vm5, %v392_v48, %v1911_v62 }
 0x16b   :  { %808 = vst [vmem:[#allocation1 + $0x1] ss:$2 sm:$0xff] %v1786_v58  ;;  %790 = vrot.lane.b32.xlu2 %v786_v0, %s1596_s14  ;;  %v520_v29 = vpop.permute.xlu2 %519 }
 0x16c   :  { %429 = vst [vmem:[#allocation3 + $0x28] sm:$0xf0] %v424_v61 }
 0x16d   :  { %404 = vst [vmem:[#allocation3 + $0x40] sm:$0xf] %v398_v1 }
 0x16e   :  { %v771_v2 = vld.sshfl [vmem:[#allocation1 + $0x10] sm:$0xff pattern:$0x75316420] }
 0x16f   :  { %784 = vst [vmem:[#allocation1 + $0x10] ss:$2 sm:$0xff] %v779_v4  ;;  %788 = vrot.lane.b32.xlu1 %v785_v63, %s1596_s14 }
 0x170   :  { %777 = vst.msk [vmem:[#allocation3 + $0xd8] sm:$0xf] %vm273_vm11, %v771_v2 }
 0x171   :  { %v422_v6 = vpop.permute.xlu1 %421  ;;  %v1917_v7 = vpop.permute.xlu0 %445 }
 0x172   :  { %v811_v8 = vld.sshfl [vmem:[#allocation1] sm:$0xff pattern:$0x75316420]  ;;  %v812_v9 = vld.sshfl [vmem:[#allocation1 + $0x8] sm:$0xff pattern:$0x75316420]  ;;  %v425_v10 = vsel %vm423_vm2, %v420_v57, %v422_v6  ;;  %v450_v14 = vsel %vm449_vm6, %v444_v5, %v1917_v7 }
 0x173   :  { %834 = vst [vmem:[#allocation1 + $0x1] ss:$2 sm:$0xff] %v1808_v12  ;;  %814 = vrot.lane.b32.xlu0 %v811_v8, %s1597_s27  ;;  %v545_v49 = vpop.permute.xlu2 %544  ;;  %v906_v57 = vld [vmem:[#allocation2 + $0x8] sm:$0xf]  ;;  %v932_v8 = vld [vmem:[#allocation2 + $0x18] sm:$0xf] }
 0x174   :  { %430 = vst [vmem:[#allocation3 + $0x30] sm:$0xf0] %v425_v10  ;;  %vm651_vm2 = vcmask 23552  }
 0x175   :  { %431 = vst.msk [vmem:[#allocation3 + $0x38] sm:$0xf0] %vm327_vm14, %v422_v6 }
 0x176   :  { %v787_v15 = vld.sshfl [vmem:[#allocation1 + $0x10] sm:$0xff pattern:$0x75316420]  ;;  %455 = vst.msk [vmem:[#allocation3 + $0x38] sm:$0xf0] %vm352_vm1, %v444_v5 }
 0x177   :  { %810 = vst [vmem:[#allocation1 + $0x11] ss:$2 sm:$0xff] %v804_v13  ;;  %792 = vrot.lane.b32.xlu1 %v787_v15, %s1596_s14 }
 0x178   :  { %456 = vst [vmem:[#allocation3 + $0x40] sm:$0xf0] %v450_v14 }
 0x179   :  { %v471_v17 = vpop.permute.xlu0 %470 }
 0x17a   :  { %v837_v19 = vld.sshfl [vmem:[#allocation1] sm:$0xff pattern:$0x75316420]  ;;  %v838_v20 = vld.sshfl [vmem:[#allocation1 + $0x8] sm:$0xff pattern:$0x75316420]  ;;  %v475_v22 = vsel %vm474_vm3, %v469_v16, %v471_v17 }
 0x17b   :  { %859 = vst [vmem:[#allocation1] ss:$2 sm:$0xff] %v1786_v58  ;;  %840 = vrot.lane.b32.xlu2 %v837_v19, %s1569_s10  ;;  %v494_v24 = vpop.permute.xlu1 %493  ;;  %v569_v60 = vpop.permute.xlu2 %568 }
 0x17c   :  { %480 = vst [vmem:[#allocation3 + $0x50] sm:$0xf] %v475_v22 }
 0x17e   :  { %v813_v26 = vld.sshfl [vmem:[#allocation1 + $0x10] sm:$0xff pattern:$0x75316420] }
 0x17f   :  { %836 = vst [vmem:[#allocation1 + $0x11] ss:$2 sm:$0xff] %v830_v27  ;;  %816 = vrot.lane.b32.xlu1 %v812_v9, %s1597_s27  ;;  %818 = vrot.lane.b32.xlu0 %v813_v26, %s1597_s27 }
 0x181   :  { %v473_v30 = vpop.permute.xlu0 %472 }
 0x182   :  { %v862_v33 = vld.sshfl [vmem:[#allocation1] sm:$0xff pattern:$0x75316420]  ;;  %v863_v34 = vld.sshfl [vmem:[#allocation1 + $0x8] sm:$0xff pattern:$0x75316420]  ;;  %v476_v36 = vsel %vm474_vm3, %v471_v17, %v473_v30 }
 0x183   :  { %884 = vst [vmem:[#allocation1] ss:$2 sm:$0xff] %v1808_v12  ;;  %842 = vrot.lane.b32.xlu2 %v838_v20, %s1569_s10  ;;  %v1932_v38 = vpop.permute.xlu1 %495  ;;  %v958_v17 = vld [vmem:[#allocation2 + $0x8] sm:$0xf]  ;;  %vm701_vm3 = vcmask 15360  }
 0x184   :  { %481 = vst [vmem:[#allocation3 + $0x58] sm:$0xf] %v476_v36  ;;  %v500_v41 = vsel %vm499_vm4, %v494_v24, %v1932_v38 }
 0x185   :  { %482 = vst.msk [vmem:[#allocation3 + $0x60] sm:$0xf] %vm273_vm11, %v473_v30 }
 0x186   :  { %v839_v40 = vld.sshfl [vmem:[#allocation1 + $0x10] sm:$0xff pattern:$0x75316420]  ;;  %505 = vst.msk [vmem:[#allocation3 + $0x60] sm:$0xf] %vm298_vm12, %v494_v24 }
 0x187   :  { %861 = vst [vmem:[#allocation1 + $0x10] ss:$2 sm:$0xff] %v856_v37  ;;  %865 = vrot.lane.b32.xlu1 %v862_v33, %s1598_s17 }
 0x188   :  { %506 = vst [vmem:[#allocation3 + $0x68] sm:$0xf] %v500_v41 }
 0x189   :  { %v522_v43 = vpop.permute.xlu0 %521 }
 0x18a   :  { %v887_v45 = vld.sshfl [vmem:[#allocation1] sm:$0xff pattern:$0x75316420]  ;;  %v888_v46 = vld.sshfl [vmem:[#allocation1 + $0x8] sm:$0xff pattern:$0x75316420]  ;;  %v525_v48 = vsel %vm265_vm10, %v520_v29, %v522_v43 }
 0x18b   :  { %910 = vst [vmem:[#allocation1 + $0x1] ss:$2 sm:$0xff] %v1786_v58  ;;  %892 = vrot.lane.b32.xlu0 %v888_v46, %s1599_s18  ;;  %844 = vrot.lane.b32.xlu2 %v839_v40, %s1569_s10  ;;  %s1600_s10 = smov 88   ;;  %v620_v9 = vpop.permute.xlu2 %619 }
 0x18c   :  { %530 = vst [vmem:[#allocation3 + $0x50] sm:$0xf0] %v525_v48 }
 0x18e   :  { %v864_v50 = vld.sshfl [vmem:[#allocation1 + $0x10] sm:$0xff pattern:$0x75316420] }
 0x18f   :  { %886 = vst [vmem:[#allocation1 + $0x10] ss:$2 sm:$0xff] %v881_v51  ;;  %890 = vrot.lane.b32.xlu1 %v887_v45, %s1599_s18  ;;  %v1006_v45 = vld [vmem:[#allocation2 + $0x8] sm:$0xf] }
 0x191   :  { %v524_v52 = vpop.permute.xlu1 %523 }
 0x192   :  { %v913_v53 = vld.sshfl [vmem:[#allocation1] sm:$0xff pattern:$0x75316420]  ;;  %v914_v54 = vld.sshfl [vmem:[#allocation1 + $0x8] sm:$0xff pattern:$0x75316420]  ;;  %v526_v56 = vsel %vm265_vm10, %v522_v43, %v524_v52 }
 0x193   :  { %936 = vst [vmem:[#allocation1 + $0x1] ss:$2 sm:$0xff] %v1808_v12  ;;  %867 = vrot.lane.b32.xlu2 %v863_v34, %s1598_s17  ;;  %v571_v61 = vpop.permute.xlu0 %570  ;;  %v646_v20 = vpop.permute.xlu2 %645  ;;  %v982_v34 = vld [vmem:[#allocation2 + $0x18] sm:$0xf] }
 0x194   :  { %531 = vst [vmem:[#allocation3 + $0x58] sm:$0xf0] %v526_v56  ;;  %v575_v0 = vsel %vm574_vm7, %v569_v60, %v571_v61 }
 0x195   :  { %532 = vst.msk [vmem:[#allocation3 + $0x60] sm:$0xf0] %vm327_vm14, %v524_v52 }
 0x196   :  { %v889_v63 = vld.sshfl [vmem:[#allocation1 + $0x10] sm:$0xff pattern:$0x75316420]  ;;  %555 = vst.msk [vmem:[#allocation3 + $0x60] sm:$0xf0] %vm352_vm1, %v545_v49 }
 0x197   :  { %912 = vst [vmem:[#allocation1 + $0x11] ss:$2 sm:$0xff] %v906_v57  ;;  %916 = vrot.lane.b32.xlu1 %v913_v53, %s1600_s10  ;;  %v1032_v57 = vld [vmem:[#allocation2 + $0x18] sm:$0xf] }
 0x198   :  { %580 = vst [vmem:[#allocation3 + $0x78] sm:$0xf] %v575_v0 }
 0x199   :  { %v1950_v1 = vpop.permute.xlu1 %546 }
 0x19a   :  { %v939_v2 = vld.sshfl [vmem:[#allocation1] sm:$0xff pattern:$0x75316420]  ;;  %v940_v4 = vld.sshfl [vmem:[#allocation1 + $0x8] sm:$0xff pattern:$0x75316420]  ;;  %v550_v5 = vsel %vm2217_vm13, %v545_v49, %v1950_v1 }
 0x19b   :  { %961 = vst [vmem:[#allocation1] ss:$2 sm:$0xff] %v1786_v58  ;;  %869 = vrot.lane.b32.xlu2 %v864_v50, %s1598_s17 }
 0x19c   :  { %556 = vst [vmem:[#allocation3 + $0x68] sm:$0xf0] %v550_v5  ;;  %v1990_v5 = vld [vmem:[#allocation2 + $0x8] sm:$0xff] }
 0x19d   :  { %v671_v43 = vpop.permute.xlu2 %670 }
 0x19e   :  { %v915_v6 = vld.sshfl [vmem:[#allocation1 + $0x10] sm:$0xff pattern:$0x75316420] }
 0x19f   :  { %938 = vst [vmem:[#allocation1 + $0x11] ss:$2 sm:$0xff] %v932_v8  ;;  %920 = vrot.lane.b32.xlu0 %v915_v6, %s1600_s10 }
 0x1a1   :  { %v594_v10 = vpop.permute.xlu1 %593  ;;  %v573_v13 = vpop.permute.xlu0 %572 }
 0x1a2   :  { %v964_v14 = vld.sshfl [vmem:[#allocation1] sm:$0xff pattern:$0x75316420]  ;;  %v965_v15 = vld.sshfl [vmem:[#allocation1 + $0x8] sm:$0xff pattern:$0x75316420]  ;;  %v576_v16 = vsel %vm574_vm7, %v571_v61, %v573_v13 }
 0x1a3   :  { %985 = vst [vmem:[#allocation1] ss:$2 sm:$0xff] %v1808_v12  ;;  %967 = vrot.lane.b32.xlu1 %v964_v14, %s1575_s24  ;;  %894 = vrot.lane.b32.xlu2 %v889_v63, %s1599_s18  ;;  %vm727_vm7 = vcmask 531456  }
 0x1a4   :  { %581 = vst [vmem:[#allocation3 + $0x80] sm:$0xf] %v576_v16  ;;  %v2003_v16 = vld [vmem:[#allocation2 + $0x18] sm:$0xff] }
 0x1a5   :  { %582 = vst.msk [vmem:[#allocation3 + $0x88] sm:$0xf] %vm273_vm11, %v573_v13 }
 0x1a6   :  { %v941_v19 = vld.sshfl [vmem:[#allocation1 + $0x10] sm:$0xff pattern:$0x75316420]  ;;  %605 = vst.msk [vmem:[#allocation3 + $0x88] sm:$0xf] %vm298_vm12, %v594_v10 }
 0x1a7   :  { %963 = vst [vmem:[#allocation1 + $0x10] ss:$2 sm:$0xff] %v958_v17  ;;  %944 = vrot.lane.b32.xlu0 %v940_v4, %s1601_s21 }
 0x1a9   :  { %v1963_v22 = vpop.permute.xlu1 %595  ;;  %v622_v24 = vpop.permute.xlu0 %621 }
 0x1aa   :  { %v988_v26 = vld.sshfl [vmem:[#allocation1] sm:$0xff pattern:$0x75316420]  ;;  %v989_v27 = vld.sshfl [vmem:[#allocation1 + $0x8] sm:$0xff pattern:$0x75316420]  ;;  %v600_v29 = vsel %vm599_vm8, %v594_v10, %v1963_v22  ;;  %v626_v30 = vsel %vm625_vm9, %v620_v9, %v622_v24 }
 0x1ab   :  { %1010 = vst [vmem:[#allocation1 + $0x1] ss:$2 sm:$0xff] %v1786_v58  ;;  %918 = vrot.lane.b32.xlu2 %v914_v54, %s1600_s10 }
 0x1ac   :  { %606 = vst [vmem:[#allocation3 + $0x90] sm:$0xf] %v600_v29 }
 0x1ad   :  { %631 = vst [vmem:[#allocation3 + $0x78] sm:$0xf0] %v626_v30  ;;  %v722_v54 = vpop.permute.xlu2 %721 }
 0x1ae   :  { %v966_v33 = vld.sshfl [vmem:[#allocation1 + $0x10] sm:$0xff pattern:$0x75316420] }
 0x1af   :  { %987 = vst [vmem:[#allocation1 + $0x10] ss:$2 sm:$0xff] %v982_v34  ;;  %946 = vrot.lane.b32.xlu0 %v941_v19, %s1601_s21  ;;  %971 = vrot.lane.b32.xlu1 %v966_v33, %s1575_s24 }
 0x1b1   :  { %v624_v36 = vpop.permute.xlu1 %623 }
 0x1b2   :  { %v1013_v37 = vld.sshfl [vmem:[#allocation1] sm:$0xff pattern:$0x75316420]  ;;  %v1014_v40 = vld.sshfl [vmem:[#allocation1 + $0x8] sm:$0xff pattern:$0x75316420]  ;;  %v627_v41 = vsel %vm625_vm9, %v622_v24, %v624_v36 }
 0x1b3   :  { %1036 = vst [vmem:[#allocation1 + $0x1] ss:$2 sm:$0xff] %v1808_v12  ;;  %942 = vrot.lane.b32.xlu2 %v939_v2, %s1601_s21  ;;  %vm753_vm9 = vcmask 7168  }
 0x1b4   :  { %632 = vst [vmem:[#allocation3 + $0x80] sm:$0xf0] %v627_v41 }
 0x1b5   :  { %633 = vst.msk [vmem:[#allocation3 + $0x88] sm:$0xf0] %vm327_vm14, %v624_v36  ;;  %v673_v46 = vpop.permute.xlu0 %672  ;;  %v748_v4 = vpop.permute.xlu2 %747 }
 0x1b6   :  { %v990_v48 = vld.sshfl [vmem:[#allocation1 + $0x10] sm:$0xff pattern:$0x75316420]  ;;  %657 = vst.msk [vmem:[#allocation3 + $0x88] sm:$0xf0] %vm352_vm1, %v646_v20  ;;  %v677_v49 = vsel %vm676_vm15, %v671_v43, %v673_v46 }
 0x1b7   :  { %1012 = vst [vmem:[#allocation1 + $0x11] ss:$2 sm:$0xff] %v1006_v45  ;;  %991 = vrot.lane.b32.xlu0 %v988_v26, %s1581_s0  ;;  %1016 = vrot.lane.b32.xlu1 %v1013_v37, %s1602_s12 }
 0x1b8   :  { %682 = vst [vmem:[#allocation3 + $0xa0] sm:$0xf] %v677_v49 }
 0x1b9   :  { %v1978_v50 = vpop.permute.xlu1 %647 }
 0x1ba   :  { %v1039_v51 = vld.sshfl [vmem:[#allocation1] sm:$0xff pattern:$0x75316420]  ;;  %v1040_v52 = vld.sshfl [vmem:[#allocation1 + $0x8] sm:$0xff pattern:$0x75316420]  ;;  %v652_v53 = vsel %vm651_vm2, %v646_v20, %v1978_v50 }
 0x1bb   :  { %1061 = vst [vmem:[#allocation1] ss:$2 sm:$0xff] %v1786_v58  ;;  %969 = vrot.lane.b32.xlu2 %v965_v15, %s1575_s24  ;;  %s1604_s24 = smov 48  }
 0x1bc   :  { %658 = vst [vmem:[#allocation3 + $0x90] sm:$0xf0] %v652_v53 }
 0x1be   :  { %v1015_v56 = vld.sshfl [vmem:[#allocation1 + $0x10] sm:$0xff pattern:$0x75316420] }
 0x1bf   :  { %1038 = vst [vmem:[#allocation1 + $0x11] ss:$2 sm:$0xff] %v1032_v57  ;;  %993 = vrot.lane.b32.xlu0 %v989_v27, %s1581_s0  ;;  %1042 = vrot.lane.b32.xlu1 %v1039_v51, %s1603_s25 }
 0x1c1   :  { %v696_v60 = vpop.permute.xlu1 %695  ;;  %v675_v61 = vpop.permute.xlu0 %674 }
 0x1c2   :  { %v1064_v63 = vld.sshfl [vmem:[#allocation1] sm:$0xff pattern:$0x75316420]  ;;  %v1065_v0 = vld.sshfl [vmem:[#allocation1 + $0x8] sm:$0xff pattern:$0x75316420]  ;;  %v678_v2 = vsel %vm676_vm15, %v673_v46, %v675_v61 }
 0x1c3   :  { %1090 = vst [vmem:[#allocation1] ss:$2 sm:$0xff] %v1808_v12  ;;  %995 = vrot.lane.b32.xlu2 %v990_v48, %s1581_s0  ;;  %vm846_vm15 = vcmask 506880  }
 0x1c4   :  { %683 = vst [vmem:[#allocation3 + $0xa8] sm:$0xf] %v678_v2 }
 0x1c5   :  { %684 = vst.msk [vmem:[#allocation3 + $0xb0] sm:$0xf] %vm273_vm11, %v675_v61  ;;  %v791_v17 = vpop.permute.xlu2 %790 }
 0x1c6   :  { %v1041_v6 = vld.sshfl [vmem:[#allocation1 + $0x10] sm:$0xff pattern:$0x75316420]  ;;  %707 = vst.msk [vmem:[#allocation3 + $0xb0] sm:$0xf] %vm298_vm12, %v696_v60 }
 0x1c7   :  { %1063 = vst [vmem:[#allocation1 + $0x10] ss:$2 sm:$0xff] %v1990_v5  ;;  %1044 = vrot.lane.b32.xlu0 %v1040_v52, %s1603_s25  ;;  %1070 = vrot.lane.b32.xlu1 %v1065_v0, %s1604_s24 }
 0x1c9   :  { %v1996_v8 = vpop.permute.xlu1 %697  ;;  %v724_v9 = vpop.permute.xlu0 %723 }
 0x1ca   :  { %v1093_v10 = vld.sshfl [vmem:[#allocation1] sm:$0xff pattern:$0x75316420]  ;;  %v1094_v13 = vld.sshfl [vmem:[#allocation1 + $0x8] sm:$0xff pattern:$0x75316420]  ;;  %v702_v14 = vsel %vm701_vm3, %v696_v60, %v1996_v8  ;;  %v728_v15 = vsel %vm727_vm7, %v722_v54, %v724_v9 }
 0x1cb   :  { %1120 = vst [vmem:[#allocation1 + $0x1] ss:$2 sm:$0xff] %v1786_v58  ;;  %1018 = vrot.lane.b32.xlu2 %v1014_v40, %s1602_s12 }
 0x1cc   :  { %708 = vst [vmem:[#allocation3 + $0xb8] sm:$0xf] %v702_v14 }
 0x1cd   :  { %733 = vst [vmem:[#allocation3 + $0xa0] sm:$0xf0] %v728_v15 }
 0x1ce   :  { %v1066_v19 = vld.sshfl [vmem:[#allocation1 + $0x10] sm:$0xff pattern:$0x75316420]  ;;  %v1067_v20 = vld.sshfl [vmem:[#allocation1 + $0x18] sm:$0xff pattern:$0x75316420] }
 0x1cf   :  { %1092 = vst [vmem:[#allocation1 + $0x10] ss:$2 sm:$0xff] %v2003_v16  ;;  %1099 = vrot.lane.b32.xlu1 %v1094_v13, %s1605_s9  ;;  %1046 = vrot.lane.b32.xlu0 %v1041_v6, %s1603_s25 }
 0x1d1   :  { %v726_v24 = vpop.permute.xlu1 %725 }
 0x1d2   :  { %v1123_v26 = vld.sshfl [vmem:[#allocation1] sm:$0xff pattern:$0x75316420]  ;;  %v1124_v27 = vld.sshfl [vmem:[#allocation1 + $0x8] sm:$0xff pattern:$0x75316420]  ;;  %v729_v29 = vsel %vm727_vm7, %v724_v9, %v726_v24 }
 0x1d3   :  { %1150 = vst [vmem:[#allocation1 + $0x1] ss:$2 sm:$0xff] %v1808_v12  ;;  %1020 = vrot.lane.b32.xlu2 %v1015_v56, %s1602_s12  ;;  %vm794_vm7 = vcmask 523264  }
 0x1d4   :  { %734 = vst [vmem:[#allocation3 + $0xa8] sm:$0xf0] %v729_v29 }
 0x1d5   :  { %735 = vst.msk [vmem:[#allocation3 + $0xb0] sm:$0xf0] %vm327_vm14, %v726_v24  ;;  %v2012_v30 = vpop.permute.xlu2 %840 }
 0x1d6   :  { %v1095_v33 = vld.sshfl [vmem:[#allocation1 + $0x10] sm:$0xff pattern:$0x75316420]  ;;  %v1096_v34 = vld.sshfl [vmem:[#allocation1 + $0x18] sm:$0xff pattern:$0x75316420] }
 0x1d7   :  { %1122 = vst [vmem:[#allocation1 + $0x11] ss:$2 sm:$0xff] %v1990_v5  ;;  %1129 = vrot.lane.b32.xlu1 %v1124_v27, %s1568_s7  ;;  %1068 = vrot.lane.b32.xlu0 %v1064_v63, %s1604_s24 }
 0x1d8   :  { %759 = vst.msk [vmem:[#allocation3 + $0xb0] sm:$0xf0] %vm352_vm1, %v748_v4 }
 0x1d9   :  { %v2018_v36 = vpop.permute.xlu1 %749 }
 0x1da   :  { %v2020_v37 = vld.sshfl [vmem:[#allocation1] sm:$0xff pattern:$0x75316420]  ;;  %v1154_v40 = vld.sshfl [vmem:[#allocation1 + $0x8] sm:$0xff pattern:$0x75316420]  ;;  %v754_v41 = vsel %vm753_vm9, %v748_v4, %v2018_v36 }
 0x1db   :  { %1179 = vst [vmem:[#allocation1] ss:$2 sm:$0xff] %v1786_v58  ;;  %1072 = vrot.lane.b32.xlu2 %v1066_v19, %s1604_s24 }
 0x1dc   :  { %760 = vst [vmem:[#allocation3 + $0xb8] sm:$0xf0] %v754_v41 }
 0x1dd   :  { %v843_v43 = vpop.permute.xlu2 %842 }
 0x1de   :  { %v1125_v45 = vld.sshfl [vmem:[#allocation1 + $0x10] sm:$0xff pattern:$0x75316420]  ;;  %v1126_v46 = vld.sshfl [vmem:[#allocation1 + $0x18] sm:$0xff pattern:$0x75316420]  ;;  %v847_v48 = vsel %vm846_vm15, %v2012_v30, %v843_v43 }
 0x1df   :  { %1152 = vst [vmem:[#allocation1 + $0x11] ss:$2 sm:$0xff] %v2003_v16  ;;  %1074 = vrot.lane.b32.xlu0 %v1067_v20, %s1604_s24  ;;  %1131 = vrot.lane.b32.xlu1 %v1125_v45, %s1568_s7 }
 0x1e0   :  { %853 = vst [vmem:[#allocation3 + $0xe0] sm:$0xf0] %v847_v48 }
 0x1e1   :  { %v789_v49 = vpop.permute.xlu1 %788 }
 0x1e2   :  { %v2031_v58 = vld.sshfl [vmem:[#allocation1 + $0x8] sm:$0xff pattern:$0x75316420]  ;;  %v795_v51 = vsel %vm794_vm7, %v789_v49, %v791_v17  ;;  %800 = vst.msk [vmem:[#allocation3 + $0xd8] sm:$0xf] %vm298_vm12, %v789_v49 }
 0x1e3   :  { %1101 = vrot.lane.b32.xlu2 %v1095_v33, %s1605_s9  ;;  %801 = vst [vmem:[#allocation3 + $0xe0] sm:$0xf] %v795_v51  ;;  %v1182_v52 = vld.sshfl [vmem:[#allocation1] sm:$0xff pattern:$0x75316420] }
 0x1e4   :  { %1208 = vst [vmem:[#allocation1] ss:$2 sm:$0xff] %v1808_v12 }
 0x1e5   :  { %v845_v53 = vpop.permute.xlu2 %844  ;;  %v815_v60 = vpop.permute.xlu0 %814 }
 0x1e6   :  { %v1155_v54 = vld.sshfl [vmem:[#allocation1 + $0x10] sm:$0xff pattern:$0x75316420]  ;;  %v1156_v56 = vld.sshfl [vmem:[#allocation1 + $0x18] sm:$0xff pattern:$0x75316420]  ;;  %v848_v57 = vsel %vm846_vm15, %v843_v43, %v845_v53 }
 0x1e7   :  { %1181 = vst [vmem:[#allocation1 + $0x10] ss:$2 sm:$0xff] %v1990_v5  ;;  %1097 = vrot.lane.b32.xlu0 %v1093_v10, %s1605_s9  ;;  %1186 = vrot.lane.b32.xlu1 %v1182_v52, %s1606_s22  ;;  %vm820_vm15 = vcmask 1031168  }
 0x1e8   :  { %854 = vst [vmem:[#allocation3 + $0xe8] sm:$0xf0] %v848_v57 }
 0x1e9   :  { %v793_v61 = vpop.permute.xlu1 %792 }
 0x1ea   :  { %v796_v63 = vsel %vm794_vm7, %v791_v17, %v793_v61  ;;  %vm871_vm7 = vcmask 1014784  }
 0x1eb   :  { %1103 = vrot.lane.b32.xlu2 %v1096_v34, %s1605_s9  ;;  %802 = vst [vmem:[#allocation3 + $0xe8] sm:$0xf] %v796_v63  ;;  %v1212_v14 = vld.sshfl [vmem:[#allocation1 + $0x8] sm:$0xff pattern:$0x75316420] }
 0x1ec   :  { %v1211_v33 = vld.sshfl [vmem:[#allocation1] sm:$0xff pattern:$0x75316420] }
 0x1ed   :  { %v868_v12 = vpop.permute.xlu2 %867 }
 0x1ee   :  { %v1184_v0 = vld.sshfl [vmem:[#allocation1 + $0x10] sm:$0xff pattern:$0x75316420]  ;;  %v1185_v2 = vld.sshfl [vmem:[#allocation1 + $0x18] sm:$0xff pattern:$0x75316420] }
 0x1ef   :  { %1127 = vrot.lane.b32.xlu0 %v1123_v26, %s1568_s7  ;;  %1190 = vrot.lane.b32.xlu1 %v1184_v0, %s1606_s22  ;;  %1210 = vst [vmem:[#allocation1 + $0x10] ss:$2 sm:$0xff] %v2003_v16 }
 0x1f1   :  { %v817_v4 = vpop.permute.xlu1 %816  ;;  %v819_v5 = vpop.permute.xlu0 %818 }
 0x1f2   :  { %v821_v6 = vsel %vm820_vm15, %v815_v60, %v817_v4  ;;  %v822_v9 = vsel %vm820_vm15, %v817_v4, %v819_v5  ;;  %828 = vst.msk [vmem:[#allocation3 + $0xd8] sm:$0xf0] %vm327_vm14, %v819_v5  ;;  %vm896_vm15 = vcmask 490496  }
 0x1f3   :  { %1133 = vrot.lane.b32.xlu2 %v1126_v46, %s1568_s7  ;;  %826 = vst [vmem:[#allocation3 + $0xc8] sm:$0xf0] %v821_v6 }
 0x1f4   :  { %827 = vst [vmem:[#allocation3 + $0xd0] sm:$0xf0] %v822_v9 }
 0x1f5   :  { %852 = vst.msk [vmem:[#allocation3 + $0xd8] sm:$0xf0] %vm352_vm1, %v2012_v30  ;;  %v870_v10 = vpop.permute.xlu2 %869 }
 0x1f6   :  { %v873_v13 = vsel %vm871_vm7, %v868_v12, %v870_v10  ;;  %879 = vst.msk [vmem:[#allocation3 + $0x100] sm:$0xf] %vm273_vm11, %v870_v10  ;;  %v1213_v41 = vld.sshfl [vmem:[#allocation1 + $0x10] sm:$0xff pattern:$0x75316420] }
 0x1f7   :  { %878 = vst [vmem:[#allocation3 + $0xf8] sm:$0xf] %v873_v13  ;;  %1159 = vrot.lane.b32.xlu0 %v1154_v40, %s1607_s29  ;;  %1217 = vrot.lane.b32.xlu1 %v1212_v14, %s1608_s8  ;;  %v1214_v46 = vld.sshfl [vmem:[#allocation1 + $0x18] sm:$0xff pattern:$0x75316420] }
 0x1f9   :  { %v866_v15 = vpop.permute.xlu1 %865 }
 0x1fa   :  { %v872_v16 = vsel %vm871_vm7, %v866_v15, %v868_v12  ;;  %vm922_vm7 = vcmask 719872  }
 0x1fb   :  { %1157 = vrot.lane.b32.xlu2 %v2020_v37, %s1607_s29  ;;  %877 = vst [vmem:[#allocation3 + $0xf0] sm:$0xf] %v872_v16 }
 0x1fd   :  { %v895_v17 = vpop.permute.xlu2 %894  ;;  %v893_v19 = vpop.permute.xlu0 %892 }
 0x1fe   :  { %v898_v20 = vsel %vm896_vm15, %v893_v19, %v895_v17 }
 0x1ff   :  { %904 = vst [vmem:[#allocation3 + $0x110] sm:$0xf] %v898_v20  ;;  %1163 = vrot.lane.b32.xlu0 %v1156_v56, %s1607_s29  ;;  %699 = vrot.lane.b32.xlu1 %v1893_v42, %s1593_s19 }
 0x201   :  { %v891_v24 = vpop.permute.xlu1 %890 }
 0x202   :  { %v897_v26 = vsel %vm896_vm15, %v891_v24, %v893_v19  ;;  %902 = vst.msk [vmem:[#allocation3 + $0x100] sm:$0xf] %vm298_vm12, %v891_v24  ;;  %vm948_vm15 = vcmask 195584  }
 0x203   :  { %1161 = vrot.lane.b32.xlu2 %v1155_v54, %s1607_s29  ;;  %903 = vst [vmem:[#allocation3 + $0x108] sm:$0xf] %v897_v26 }
 0x205   :  { %v919_v27 = vpop.permute.xlu2 %918 }
 0x207   :  { %342 = vrot.lane.b32.xlu0 %v1826_v25, %s1584_s20  ;;  %649 = vrot.lane.b32.xlu1 %v1880_v28, %s1592_s26 }
 0x209   :  { %v917_v29 = vpop.permute.xlu1 %916 }
 0x20a   :  { %v923_v30 = vsel %vm922_vm7, %v917_v29, %v919_v27 }
 0x20b   :  { %1188 = vrot.lane.b32.xlu2 %v2031_v58, %s1606_s22  ;;  %928 = vst [vmem:[#allocation3 + $0xf0] sm:$0xf0] %v923_v30 }
 0x20d   :  { %v943_v42 = vpop.permute.xlu2 %942 }
 0x20f   :  { %1215 = vrot.lane.b32.xlu0 %v1211_v33, %s1608_s8  ;;  %395 = vrot.lane.b32.xlu1 %v1837_v39, %s1565_s23 }
 0x211   :  { %v921_v34 = vpop.permute.xlu0 %920 }
 0x212   :  { %v924_v37 = vsel %vm922_vm7, %v919_v27, %v921_v34  ;;  %930 = vst.msk [vmem:[#allocation3 + $0x100] sm:$0xf0] %vm327_vm14, %v921_v34  ;;  %vm1022_vm7 = vcmask 687104  }
 0x213   :  { %1192 = vrot.lane.b32.xlu2 %v1185_v2, %s1606_s22  ;;  %929 = vst [vmem:[#allocation3 + $0xf8] sm:$0xf0] %v924_v37 }
 0x214   :  { %954 = vst.msk [vmem:[#allocation3 + $0x100] sm:$0xf0] %vm352_vm1, %v943_v42 }
 0x215   :  { %v968_v25 = vpop.permute.xlu1 %967  ;;  %v970_v28 = vpop.permute.xlu2 %969 }
 0x216   :  { %v973_v40 = vsel %vm265_vm10, %v968_v25, %v970_v28 }
 0x217   :  { %978 = vst [vmem:[#allocation3 + $0x118] sm:$0xf] %v973_v40  ;;  %344 = vrot.lane.b32.xlu1 %v1831_v31, %s1584_s20  ;;  %1219 = vrot.lane.b32.xlu0 %v1213_v41, %s1608_s8 }
 0x219   :  { %v945_v39 = vpop.permute.xlu0 %944 }
 0x21a   :  { %v949_v43 = vsel %vm948_vm15, %v943_v42, %v945_v39 }
 0x21b   :  { %315 = vrot.lane.b32.xlu2 %v1820_v21, %s1582_s28  ;;  %955 = vst [vmem:[#allocation3 + $0x108] sm:$0xf0] %v949_v43 }
 0x21d   :  { %v996_v45 = vpop.permute.xlu2 %995 }
 0x21f   :  { %1221 = vrot.lane.b32.xlu0 %v1214_v46, %s1608_s8 }
 0x221   :  { %v972_v48 = vpop.permute.xlu1 %971  ;;  %v947_v49 = vpop.permute.xlu0 %946 }
 0x222   :  { %v974_v58 = vsel %vm265_vm10, %v970_v28, %v972_v48  ;;  %980 = vst.msk [vmem:[#allocation3 + $0x128] sm:$0xf] %vm273_vm11, %v972_v48  ;;  %v950_v31 = vsel %vm948_vm15, %v945_v39, %v947_v49  ;;  %vm1076_vm10 = vcmask 392192   ;;  %vm1048_vm15 = vcmask 162816  }
 0x223   :  { %751 = vrot.lane.b32.xlu2 %v1905_v59, %s1595_s16  ;;  %979 = vst [vmem:[#allocation3 + $0x120] sm:$0xf] %v974_v58 }
 0x224   :  { %956 = vst [vmem:[#allocation3 + $0x110] sm:$0xf0] %v950_v31 }
 0x225   :  { %v1019_v51 = vpop.permute.xlu2 %1018 }
 0x227   :  { %597 = vrot.lane.b32.xlu0 %v1865_v11, %s1590_s15 }
 0x229   :  { %v1017_v21 = vpop.permute.xlu1 %1016  ;;  %v992_v52 = vpop.permute.xlu0 %991 }
 0x22a   :  { %v1023_v53 = vsel %vm1022_vm7, %v1017_v21, %v1019_v51  ;;  %1002 = vst.msk [vmem:[#allocation3 + $0x128] sm:$0xf] %vm298_vm12, %v992_v52 }
 0x22b   :  { %497 = vrot.lane.b32.xlu2 %v1851_v55, %s1588_s30  ;;  %1028 = vst [vmem:[#allocation3 + $0x118] sm:$0xf0] %v1023_v53 }
 0x22d   :  { %v1021_v54 = vpop.permute.xlu2 %1020 }
 0x22e   :  { %v1024_v56 = vsel %vm1022_vm7, %v1019_v51, %v1021_v54  ;;  %1030 = vst.msk [vmem:[#allocation3 + $0x128] sm:$0xf0] %vm327_vm14, %v1021_v54  ;;  %vm1105_vm7 = vcmask 916480  }
 0x22f   :  { %1029 = vst [vmem:[#allocation3 + $0x120] sm:$0xf0] %v1024_v56  ;;  %548 = vrot.lane.b32.xlu0 %v1859_v3, %s1581_s0 }
 0x231   :  { %v1043_v59 = vpop.permute.xlu1 %1042  ;;  %v994_v11 = vpop.permute.xlu0 %993 }
 0x232   :  { %1054 = vst.msk [vmem:[#allocation3 + $0x128] sm:$0xf0] %vm352_vm1, %v1043_v59  ;;  %v997_v57 = vsel %vm2217_vm13, %v992_v52, %v994_v11  ;;  %v998_v60 = vsel %vm2217_vm13, %v994_v11, %v996_v45  ;;  %vm1135_vm13 = vcmask 375808   ;;  %v1269_v52 = vld [vmem:[#allocation3 + $0x118] sm:$0xff] }
 0x233   :  { %447 = vrot.lane.b32.xlu2 %v1844_v47, %s1586_s6  ;;  %1003 = vst [vmem:[#allocation3 + $0x130] sm:$0xf] %v997_v57  ;;  %v1265_v57 = vld [vmem:[#allocation3 + $0xf8] sm:$0xff] }
 0x234   :  { %1004 = vst [vmem:[#allocation3 + $0x138] sm:$0xf] %v998_v60 }
 0x235   :  { %v1073_v55 = vpop.permute.xlu2 %1072 }
 0x236   :  { %v1270_v56 = vld [vmem:[#allocation3 + $0x120] sm:$0xff] }
 0x237   :  { %290 = vrot.lane.b32.xlu0 %v1824_v23, %s1581_s0 }
 0x239   :  { %v1071_v3 = vpop.permute.xlu1 %1070  ;;  %v1045_v61 = vpop.permute.xlu0 %1044 }
 0x23a   :  { %v1078_v63 = vsel %vm1076_vm10, %v1071_v3, %v1073_v55  ;;  %v1049_v12 = vsel %vm1048_vm15, %v1043_v59, %v1045_v61  ;;  %v1264_v59 = vld [vmem:[#allocation3 + $0xf0] sm:$0xff] }
 0x23b   :  { %1084 = vst [vmem:[#allocation3 + $0x148] sm:$0xf] %v1078_v63  ;;  %v1255_v63 = vld [vmem:[#allocation3 + $0xa8] sm:$0xff] }
 0x23c   :  { %1055 = vst [vmem:[#allocation3 + $0x130] sm:$0xf0] %v1049_v12 }
 0x23d   :  { %v1102_v0 = vpop.permute.xlu2 %1101 }
 0x241   :  { %v1100_v2 = vpop.permute.xlu1 %1099  ;;  %v1047_v4 = vpop.permute.xlu0 %1046 }
 0x242   :  { %v1107_v47 = vsel %vm1105_vm7, %v1100_v2, %v1102_v0  ;;  %v1050_v5 = vsel %vm1048_vm15, %v1045_v61, %v1047_v4  ;;  %vm1194_vm15 = vcmask 359424   ;;  %v1254_v61 = vld [vmem:[#allocation3 + $0xa0] sm:$0xff] }
 0x243   :  { %1113 = vst [vmem:[#allocation3 + $0x158] sm:$0xf] %v1107_v47  ;;  %v1250_v4 = vld [vmem:[#allocation3 + $0x80] sm:$0xff]  ;;  %v1244_v47 = vld [vmem:[#allocation3 + $0x50] sm:$0xff] }
 0x244   :  { %1056 = vst [vmem:[#allocation3 + $0x138] sm:$0xf0] %v1050_v5 }
 0x245   :  { %v1104_v6 = vpop.permute.xlu2 %1103 }
 0x246   :  { %v1108_v23 = vsel %vm1105_vm7, %v1102_v0, %v1104_v6  ;;  %v1245_v6 = vld [vmem:[#allocation3 + $0x58] sm:$0xff] }
 0x247   :  { %1114 = vst [vmem:[#allocation3 + $0x160] sm:$0xf] %v1108_v23 }
 0x249   :  { %v1130_v9 = vpop.permute.xlu1 %1129  ;;  %v1069_v10 = vpop.permute.xlu0 %1068 }
 0x24a   :  { %v1077_v13 = vsel %vm1076_vm10, %v1069_v10, %v1071_v3  ;;  %v1259_v3 = vld [vmem:[#allocation3 + $0xc8] sm:$0xff] }
 0x24b   :  { %1083 = vst [vmem:[#allocation3 + $0x140] sm:$0xf] %v1077_v13 }
 0x24d   :  { %v1134_v14 = vpop.permute.xlu2 %1133 }
 0x251   :  { %v1132_v15 = vpop.permute.xlu1 %1131  ;;  %v1075_v16 = vpop.permute.xlu0 %1074 }
 0x252   :  { %v1137_v17 = vsel %vm1135_vm13, %v1130_v9, %v1132_v15  ;;  %v1138_v19 = vsel %vm1135_vm13, %v1132_v15, %v1134_v14  ;;  %v1079_v20 = vsel %vm1076_vm10, %v1073_v55, %v1075_v16 }
 0x253   :  { %1143 = vst [vmem:[#allocation3 + $0x148] sm:$0xf0] %v1137_v17 }
 0x254   :  { %1144 = vst.msk [vmem:[#allocation3 + $0x150] sm:$0xf0] %vm327_vm14, %v1138_v19  ;;  %vm1165_vm14 = vcmask 900096   ;;  %v2135_v19 = vld [vmem:[%s2212_s1] sm:$0xff] }
 0x255   :  { %1085 = vst.msk [vmem:[#allocation3 + $0x150] sm:$0xf] %vm273_vm11, %v1079_v20  ;;  %v1158_v24 = vpop.permute.xlu2 %1157 }
 0x259   :  { %v1187_v26 = vpop.permute.xlu1 %1186  ;;  %v1098_v27 = vpop.permute.xlu0 %1097 }
 0x25a   :  { %v1106_v29 = vsel %vm1105_vm7, %v1098_v27, %v1100_v2  ;;  %v1275_v31 = vld [vmem:[#allocation3 + $0x148] sm:$0xff]  ;;  %v1249_v2 = vld [vmem:[#allocation3 + $0x78] sm:$0xff] }
 0x25b   :  { %1112 = vst.msk [vmem:[#allocation3 + $0x150] sm:$0xf] %vm298_vm12, %v1106_v29 }
 0x25d   :  { %v1162_v30 = vpop.permute.xlu2 %1161 }
 0x261   :  { %v1191_v42 = vpop.permute.xlu1 %1190  ;;  %v1128_v33 = vpop.permute.xlu0 %1127 }
 0x262   :  { %v1136_v34 = vsel %vm1135_vm13, %v1128_v33, %v1130_v9  ;;  %vm346_vm13 = vcmask 351232   ;;  %v1239_v9 = vld [vmem:[#allocation3 + $0x28] sm:$0xff]  ;;  %v1266_v33 = vld [vmem:[#allocation3 + $0x100] sm:$0xff] }
 0x263   :  { %1142 = vst [vmem:[#allocation3 + $0x140] sm:$0xf0] %v1136_v34 }
 0x265   :  { %v1189_v37 = vpop.permute.xlu2 %1188 }
 0x266   :  { %v1195_v25 = vsel %vm1194_vm15, %v1187_v26, %v1189_v37  ;;  %v1196_v28 = vsel %vm1194_vm15, %v1189_v37, %v1191_v42 }
 0x267   :  { %1201 = vst [vmem:[#allocation3 + $0x168] sm:$0xf] %v1195_v25  ;;  %v1261_v25 = vld [vmem:[#allocation3 + $0xd8] sm:$0xff] }
 0x268   :  { %1202 = vst [vmem:[#allocation3 + $0x170] sm:$0xf] %v1196_v28 }
 0x269   :  { %v2106_v40 = vpop.permute.xlu1 %1217  ;;  %v1160_v41 = vpop.permute.xlu0 %1159 }
 0x26a   :  { %v1166_v39 = vsel %vm1165_vm14, %v1158_v24, %v1160_v41  ;;  %v1167_v43 = vsel %vm1165_vm14, %v1160_v41, %v1162_v30  ;;  %v1274_v58 = vld [vmem:[#allocation3 + $0x140] sm:$0xff] }
 0x26b   :  { %1172 = vst.msk [vmem:[#allocation3 + $0x150] sm:$0xf0] %vm352_vm1, %v1166_v39  ;;  %vm1223_vm1 = vcmask 883712   ;;  %v1272_v39 = vld [vmem:[#allocation3 + $0x130] sm:$0xff] }
 0x26c   :  { %1173 = vst [vmem:[#allocation3 + $0x158] sm:$0xf0] %v1167_v43  ;;  %v1246_v43 = vld [vmem:[#allocation3 + $0x60] sm:$0xff] }
 0x26d   :  { %v1193_v45 = vpop.permute.xlu2 %1192 }
 0x26e   :  { %v1197_v46 = vsel %vm1194_vm15, %v1191_v42, %v1193_v45  ;;  %v1279_v48 = vld [vmem:[#allocation3 + $0x168] sm:$0xf] }
 0x26f   :  { %1203 = vst.msk [vmem:[#allocation3 + $0x178] sm:$0xf] %vm273_vm11, %v1197_v46  ;;  %1501 = vmatpush.msk.msra.mxu0 %vm21_vm0, %v1279_v48  ;;  %v1280_v49 = vld [vmem:[#allocation3 + $0x170] sm:$0xf]  ;;  %vm319_vm11 = vcmask 875520   ;;  %v1271_v42 = vld [vmem:[#allocation3 + $0x128] sm:$0xff] }
 0x270   :  { %1503 = vmatpush.msk.msra.mxu1 %vm21_vm0, %v1280_v49  ;;  %v1267_v45 = vld [vmem:[#allocation3 + $0x108] sm:$0xff] }
 0x271   :  { %1310 = vmatpush.msra.mxu0 %v1274_v58  ;;  %v700_v51 = vpop.permute.xlu1 %699  ;;  %v1164_v21 = vpop.permute.xlu0 %1163  ;;  %v1241_v58 = vld [vmem:[#allocation3 + $0x38] sm:$0xff] }
 0x272   :  { %1330 = vmatpush.msra.mxu1 %v1275_v31  ;;  %v703_v53 = vsel %vm701_vm3, %v1996_v8, %v700_v51  ;;  %v1168_v54 = vsel %vm1165_vm14, %v1162_v30, %v1164_v21  ;;  %v1260_v8 = vld [vmem:[#allocation3 + $0xd0] sm:$0xff]  ;;  %v1262_v31 = vld [vmem:[#allocation3 + $0xe0] sm:$0xff] }
 0x273   :  { %1311 = vmatpush.msra.mxu0 %v1269_v52  ;;  %709 = vst [vmem:[#allocation3 + $0xc0] sm:$0xf] %v703_v53  ;;  %v1276_v29 = vld [vmem:[#allocation3 + $0x150] sm:$0xff]  ;;  %v1277_v41 = vld [vmem:[#allocation3 + $0x158] sm:$0xff] }
 0x274   :  { %1331 = vmatpush.msra.mxu1 %v1270_v56  ;;  %1174 = vst [vmem:[#allocation3 + $0x160] sm:$0xf0] %v1168_v54  ;;  %v1236_v21 = vld [vmem:[#allocation3 + $0x10] sm:$0xff]  ;;  %v1257_v52 = vld [vmem:[#allocation3 + $0xb8] sm:$0xff]  ;;  %v1247_v56 = vld [vmem:[#allocation3 + $0x68] sm:$0xff] }
 0x275   :  { %v316_v11 = vpop.permute.xlu2 %315  ;;  %1312 = vmatpush.msra.mxu0 %v1264_v59  ;;  %v1273_v53 = vld [vmem:[#allocation3 + $0x138] sm:$0xff]  ;;  %v1252_v54 = vld [vmem:[#allocation3 + $0x90] sm:$0xff] }
 0x276   :  { %v320_v60 = vsel %vm319_vm11, %v1884_v32, %v316_v11  ;;  %v321_v55 = vsel %vm319_vm11, %v316_v11, %v1888_v35  ;;  %1332 = vmatpush.msra.mxu1 %v1265_v57  ;;  %v1263_v57 = vld [vmem:[#allocation3 + $0xe8] sm:$0xff] }
 0x277   :  { %325 = vst [vmem:[#allocation3] sm:$0xf0] %v320_v60  ;;  %1313 = vmatpush.msra.mxu0 %v1259_v3  ;;  %v1242_v60 = vld [vmem:[#allocation3 + $0x40] sm:$0xff] }
 0x278   :  { %326 = vst [vmem:[#allocation3 + $0x8] sm:$0xf0] %v321_v55  ;;  %1333 = vmatpush.msra.mxu1 %v1260_v8 }
 0x279   :  { %1314 = vmatpush.msra.mxu0 %v1254_v61  ;;  %v650_v12 = vpop.permute.xlu1 %649  ;;  %v343_v0 = vpop.permute.xlu0 %342 }
 0x27a   :  { %1334 = vmatpush.msra.mxu1 %v1255_v63  ;;  %v653_v32 = vsel %vm651_vm2, %v1978_v50, %v650_v12  ;;  %v347_v35 = vsel %vm346_vm13, %v1897_v44, %v343_v0  ;;  %v1240_v50 = vld [vmem:[#allocation3 + $0x30] sm:$0xff]  ;;  %vm1284_vm2 = vcmask 621568  }
 0x27b   :  { %1315 = vmatpush.msra.mxu0 %v1249_v2  ;;  %659 = vst [vmem:[#allocation3 + $0x98] sm:$0xf0] %v653_v32  ;;  %v1278_v51 = vld [vmem:[#allocation3 + $0x160] sm:$0xff]  ;;  %v1403_v2 = vld [vmem:[%s2213_s2] sm:$0x1f] }
 0x27c   :  { %1335 = vmatpush.msra.mxu1 %v1250_v4  ;;  %354 = vst [vmem:[#allocation3 + $0x18] sm:$0xf0] %v347_v35  ;;  %v1405_v32 = vperm.slane %v1403_v2, 0  ;;  %v1406_v35 = vperm.slane %v1403_v2, 1 }
 0x27d   :  { %v752_v5 = vpop.permute.xlu2 %751  ;;  %1316 = vmatpush.msra.mxu0 %v1244_v47 }
 0x27e   :  { %v755_v23 = vsel %vm753_vm9, %v2018_v36, %v752_v5  ;;  %1336 = vmatpush.msra.mxu1 %v1245_v6  ;;  %v1234_v44 = vld [vmem:[#allocation3] sm:$0xff]  ;;  %v1407_v6 = vperm.slane %v1403_v2, 2 }
 0x27f   :  { %761 = vst [vmem:[#allocation3 + $0xc0] sm:$0xf0] %v755_v23  ;;  %1317 = vmatpush.msra.mxu0 %v1239_v9  ;;  %v1235_v10 = vld [vmem:[#allocation3 + $0x8] sm:$0xff] }
 0x280   :  { %1337 = vmatpush.msra.mxu1 %v1240_v50 }
 0x281   :  { %1318 = vmatpush.msra.mxu0 %v1234_v44  ;;  %v396_v13 = vpop.permute.xlu1 %395  ;;  %v1216_v14 = vpop.permute.xlu0 %1215  ;;  %v1408_v44 = vperm.slane %v1403_v2, 3 }
 0x282   :  { %1338 = vmatpush.msra.mxu1 %v1235_v10  ;;  %v399_v15 = vsel %vm397_vm5, %v1911_v62, %v396_v13  ;;  %v1224_v16 = vsel %vm1223_vm1, %v1216_v14, %v2106_v40  ;;  %1502 = vmatmul.msk.f32.vlgmr.msra.gmra.mxu0 %vm1284_vm2, %v2135_v19 }
 0x283   :  { %405 = vst [vmem:[#allocation3 + $0x48] sm:$0xf] %v399_v15  ;;  %1504 = vmatmul.msk.f32.vlgmr.msra.gmra.mxu1 %vm1284_vm2, %v2135_v19  ;;  %v1237_v3 = vld [vmem:[#allocation3 + $0x18] sm:$0xff]  ;;  %v1409_v15 = vperm.slane %v1403_v2, 4 }
 0x284   :  { %1230 = vst.msk [vmem:[#allocation3 + $0x178] sm:$0xf] %vm298_vm12, %v1224_v16 }
 0x285   :  { %v498_v36 = vpop.permute.xlu2 %497 }
 0x286   :  { %v501_v17 = vsel %vm499_vm4, %v1932_v38, %v498_v36  ;;  %v1258_v55 = vld [vmem:[#allocation3 + $0xc0] sm:$0xff] }
 0x287   :  { %507 = vst [vmem:[#allocation3 + $0x70] sm:$0xf] %v501_v17 }
 0x289   :  { %v345_v62 = vpop.permute.xlu1 %344  ;;  %v1220_v20 = vpop.permute.xlu0 %1219 }
 0x28a   :  { %v348_v24 = vsel %vm346_vm13, %v343_v0, %v345_v62  ;;  %v1225_v38 = vsel %vm1223_vm1, %v2106_v40, %v1220_v20  ;;  %v1256_v40 = vld [vmem:[#allocation3 + $0xb0] sm:$0xff]  ;;  %v1609_v62 = vmov 512.0  }
 0x28b   :  { %355 = vst [vmem:[#allocation3 + $0x20] sm:$0xf0] %v348_v24  ;;  %v1281_v26 = vld [vmem:[#allocation3 + $0x178] sm:$0xf]  ;;  %1560 = vrcp.f32 %v1609_v62 }
 0x28c   :  { %1231 = vst [vmem:[#allocation3 + $0x180] sm:$0xf] %v1225_v38  ;;  %1505 = vmatpush.msk.msra.mxu2 %vm21_vm0, %v1281_v26 }
 0x28d   :  { %v448_v27 = vpop.permute.xlu2 %447 }
 0x28e   :  { %v451_v30 = vsel %vm449_vm6, %v1917_v7, %v448_v27  ;;  %1350 = vmatpush.msra.mxu2 %v1276_v29  ;;  %v1251_v7 = vld [vmem:[#allocation3 + $0x88] sm:$0xff] }
 0x28f   :  { %457 = vst [vmem:[#allocation3 + $0x48] sm:$0xf0] %v451_v30 }
 0x290   :  { %1351 = vmatpush.msra.mxu2 %v1271_v42 }
 0x291   :  { %v1222_v34 = vpop.permute.xlu0 %1221 }
 0x292   :  { %1352 = vmatpush.msra.mxu2 %v1266_v33  ;;  %v1226_v37 = vsel %vm1223_vm1, %v1220_v20, %v1222_v34  ;;  %v1561_v20 = vpop.eup %1560 }
 0x293   :  { %1232 = vst [vmem:[#allocation3 + $0x188] sm:$0xf] %v1226_v37  ;;  %v1282_v28 = vld [vmem:[#allocation3 + $0x180] sm:$0xf]  ;;  %v1427_v24 = vmul.f32 512.0, %v1561_v20  ;;  %vm1431_vm5 = vweird.f32 %v1561_v20 }
 0x294   :  { %1353 = vmatpush.msra.mxu2 %v1261_v25  ;;  %1507 = vmatpush.msk.msra.mxu3 %vm21_vm0, %v1282_v28 }
 0x295   :  { %v1428_v38 = vsub.f32 1.0, %v1427_v24 }
 0x296   :  { %1354 = vmatpush.msra.mxu2 %v1256_v40  ;;  %1370 = vmatpush.msra.mxu3 %v1277_v41 }
 0x297   :  { %v1429_v26 = vmul.f32 %v1561_v20, %v1428_v38 }
 0x298   :  { %1355 = vmatpush.msra.mxu2 %v1251_v7  ;;  %1371 = vmatpush.msra.mxu3 %v1272_v39 }
 0x299   :  { %v598_v46 = vpop.permute.xlu0 %597  ;;  %v1430_v27 = vadd.f32 %v1561_v20, %v1429_v26 }
 0x29a   :  { %1356 = vmatpush.msra.mxu2 %v1246_v43  ;;  %1372 = vmatpush.msra.mxu3 %v1267_v45  ;;  %v601_v48 = vsel %vm599_vm8, %v1963_v22, %v598_v46  ;;  %v1283_v49 = vld [vmem:[#allocation3 + $0x188] sm:$0xf]  ;;  %v1268_v22 = vld [vmem:[#allocation3 + $0x110] sm:$0xff] }
 0x29b   :  { %607 = vst [vmem:[#allocation3 + $0x98] sm:$0xf] %v601_v48  ;;  %1509 = vmatpush.msk.msrb.mxu0 %vm21_vm0, %v1283_v49  ;;  %vm2222_vm0 = vcmask 179200   ;;  %v1432_v29 = vsel %vm1431_vm5, %v1561_v20, %v1430_v27 }
 0x29c   :  { %1357 = vmatpush.msra.mxu2 %v1241_v58  ;;  %1373 = vmatpush.msra.mxu3 %v1262_v31  ;;  %vm2223_vm12 = vmmov %vm2222_vm0 }
 0x29d   :  { %1390 = vmatpush.msrb.mxu0 %v1278_v51 }
 0x29e   :  { %1358 = vmatpush.msra.mxu2 %v1236_v21  ;;  %1374 = vmatpush.msra.mxu3 %v1257_v52 }
 0x29f   :  { %1391 = vmatpush.msrb.mxu0 %v1273_v53  ;;  %1506 = vmatmul.msk.f32.vlgmr.msra.gmra.mxu2 %vm1284_vm2, %v2135_v19  ;;  %v1610_v53 = vmov 0  }
 0x2a0   :  { %1375 = vmatpush.msra.mxu3 %v1252_v54  ;;  %1558 = vset.pattern.permute.xlu1 %v1610_v53 }
 0x2a1   :  { %1392 = vmatpush.msrb.mxu0 %v1268_v22  ;;  %v549_v59 = vpop.permute.xlu0 %548  ;;  %1559 = vset.pattern.permute.xlu0 %v1610_v53 }
 0x2a2   :  { %1376 = vmatpush.msra.mxu3 %v1247_v56  ;;  %v551_v11 = vsel %vm2222_vm0, %v1950_v1, %v549_v59  ;;  %v1253_v8 = vld [vmem:[#allocation3 + $0x98] sm:$0xff]  ;;  %v1243_v1 = vld [vmem:[#allocation3 + $0x48] sm:$0xff] }
 0x2a3   :  { %557 = vst [vmem:[#allocation3 + $0x70] sm:$0xf0] %v551_v11  ;;  %1393 = vmatpush.msrb.mxu0 %v1263_v57 }
 0x2a4   :  { %1377 = vmatpush.msra.mxu3 %v1242_v60 }
 0x2a5   :  { %1394 = vmatpush.msrb.mxu0 %v1258_v55 }
 0x2a6   :  { %1378 = vmatpush.msra.mxu3 %v1237_v3 }
 0x2a7   :  { %1395 = vmatpush.msrb.mxu0 %v1253_v8  ;;  %1508 = vmatmul.msk.f32.vlgmr.msra.gmra.mxu3 %vm1284_vm2, %v2135_v19  ;;  %v1456_v8 = vld [vmem:[%s2214_s3] sm:$0xff] }
 0x2a9   :  { %v291_v61 = vpop.permute.xlu0 %290 }
 0x2aa   :  { %v294_v63 = vsel %vm2223_vm12, %v1873_v18, %v291_v61  ;;  %v1248_v12 = vld [vmem:[#allocation3 + $0x70] sm:$0xff] }
 0x2ab   :  { %301 = vst [vmem:[#allocation3 + $0x20] sm:$0xf] %v294_v63  ;;  %1396 = vmatpush.msrb.mxu0 %v1248_v12 }
 0x2ad   :  { %1397 = vmatpush.msrb.mxu0 %v1243_v1  ;;  %v1469_v1 = vld [vmem:[%s2215_s4] sm:$0xff] }
 0x2b2   :  { %v1238_v0 = vld [vmem:[#allocation3 + $0x20] sm:$0xff] }
 0x2b3   :  { %1398 = vmatpush.msrb.mxu0 %v1238_v0 }
 0x2b4   :  { %1510 = vmatmul.msk.f32.vlgmr.msrb.gmra.mxu0 %vm1284_vm2, %v2135_v19 }
 0x2ff   :  { %v2165_v4 = vpop.f32.mrf.mxu0 }
 0x300   :  { %v2167_v47 = vpop.f32.mrf.mxu1  ;;  %v1415_v18 = vmul.f32 %v1405_v32, %v2165_v4 }
 0x301   :  { %v1416_v5 = vmul.f32 %v1406_v35, %v2167_v47 }
 0x303   :  { %v1420_v9 = vadd.f32 %v1416_v5, %v1415_v18 }
 0x322   :  { %v2171_v23 = vpop.f32.mrf.mxu2 }
 0x323   :  { %v1417_v50 = vmul.f32 %v1407_v6, %v2171_v23 }
 0x325   :  { %v1421_v13 = vadd.f32 %v1420_v9, %v1417_v50 }
 0x32a   :  { %v2174_v10 = vpop.f32.mrf.mxu3 }
 0x32b   :  { %v1418_v14 = vmul.f32 %v1408_v44, %v2174_v10 }
 0x32d   :  { %v1422_v36 = vadd.f32 %v1421_v13, %v1418_v14 }
 0x331   :  { %v2177_v16 = vpop.f32.mrf.mxu0 }
 0x332   :  { %v1419_v17 = vmul.f32 %v1409_v15, %v2177_v16 }
 0x334   :  { %v1423_v19 = vadd.f32 %v1422_v36, %v1419_v17 }
 0x336   :  { %1424 = vadd.xlane.f32.xlu2 %v1423_v19 }
 0x3a9   :  { %v1425_v30 = vpop.xlane.xlu2 %1424 }
 0x3aa   :  { %v1433_v42 = vmul.f32 %v1432_v29, %v1425_v30 }
 0x3ac   :  { %v1434_v33 = vsub.f32 %v2165_v4, %v1433_v42  ;;  %v1435_v34 = vsub.f32 %v2167_v47, %v1433_v42  ;;  %v1436_v37 = vsub.f32 %v2171_v23, %v1433_v42  ;;  %v1437_v25 = vsub.f32 %v2174_v10, %v1433_v42 }
 0x3ad   :  { %v1438_v28 = vsub.f32 %v2177_v16, %v1433_v42 }
 0x3ae   :  { %v1439_v40 = vmul.f32 %v1434_v33, %v1405_v32  ;;  %v1440_v41 = vmul.f32 %v1435_v34, %v1406_v35  ;;  %v1441_v7 = vmul.f32 %v1436_v37, %v1407_v6  ;;  %v1442_v39 = vmul.f32 %v1437_v25, %v1408_v44 }
 0x3af   :  { %v1443_v46 = vmul.f32 %v1438_v28, %v1409_v15 }
 0x3b0   :  { %v1444_v43 = vmul.f32 %v1439_v40, %v1439_v40  ;;  %v1445_v45 = vmul.f32 %v1440_v41, %v1440_v41  ;;  %v1446_v48 = vmul.f32 %v1441_v7, %v1441_v7  ;;  %v1447_v58 = vmul.f32 %v1442_v39, %v1442_v39 }
 0x3b1   :  { %v1448_v51 = vmul.f32 %v1443_v46, %v1443_v46 }
 0x3b2   :  { %v1449_v49 = vadd.f32 %v1445_v45, %v1444_v43 }
 0x3b4   :  { %v1450_v31 = vadd.f32 %v1449_v49, %v1446_v48 }
 0x3b6   :  { %v1451_v21 = vadd.f32 %v1450_v31, %v1447_v58 }
 0x3b8   :  { %v1452_v52 = vadd.f32 %v1451_v21, %v1448_v51 }
 0x3ba   :  { %1453 = vadd.xlane.f32.xlu0 %v1452_v52 }
 0x42d   :  { %v1454_v54 = vpop.xlane.xlu0 %1453 }
 0x42e   :  { %v1455_v22 = vmul.f32 %v1454_v54, %v1432_v29 }
 0x430   :  { %v1457_v56 = vadd.f32 1e-05, %v1455_v22 }
 0x432   :  { %1562 = vrsqrt.f32 %v1457_v56  ;;  %vm1464_vm4 = vweird.f32 %v1457_v56 }
 0x438   :  { %v1563_v59 = vpop.eup %1562 }
 0x439   :  { %v1459_v11 = vmul.f32 %v1563_v59, %v1457_v56  ;;  %vm1465_vm6 = vweird.f32 %v1563_v59 }
 0x43a   :  { %vm1466_vm8 = vmor %vm1464_vm4, %vm1465_vm6 }
 0x43b   :  { %v1460_v57 = vmul.f32 %v1563_v59, %v1459_v11 }
 0x43d   :  { %v1461_v60 = vmul.f32 0.5, %v1460_v57 }
 0x43f   :  { %v1462_v55 = vsub.f32 1.5, %v1461_v60 }
 0x441   :  { %v1463_v3 = vmul.f32 %v1563_v59, %v1462_v55 }
 0x443   :  { %v1467_v61 = vsel %vm1466_vm8, %v1563_v59, %v1463_v3 }
 0x444   :  { %v1468_v63 = vmul.f32 %v1467_v61, %v1456_v8 }
 0x446   :  { %1474 = vperm.xlu1 %1558, %v1468_v63   ;;  %v1470_v12 = vmul.f32 %v1468_v63, %v1433_v42 }
 0x448   :  { %v1471_v0 = vsub.f32 %v1469_v1, %v1470_v12 }
 0x44e   :  { %1484 = vperm.xlu1 %1558, %v1471_v0  }
 0x4b8   :  { %v1475_v2 = vpop.permute.xlu1 %1474 }
 0x4b9   :  { %v1477_v32 = vmul.f32 %v1475_v2, %v2165_v4  ;;  %v1478_v35 = vmul.f32 %v1475_v2, %v2167_v47  ;;  %v1479_v18 = vmul.f32 %v1475_v2, %v2171_v23  ;;  %v1480_v5 = vmul.f32 %v1475_v2, %v2174_v10 }
 0x4ba   :  { %v1481_v9 = vmul.f32 %v1475_v2, %v2177_v16 }
 0x4c0   :  { %v1485_v6 = vpop.permute.xlu1 %1484 }
 0x4c1   :  { %v1487_v50 = vadd.f32 %v1485_v6, %v1477_v32  ;;  %v1488_v44 = vadd.f32 %v1485_v6, %v1478_v35  ;;  %v1489_v13 = vadd.f32 %v1485_v6, %v1479_v18  ;;  %v1490_v14 = vadd.f32 %v1485_v6, %v1480_v5 }
 0x4c2   :  { %v1491_v15 = vadd.f32 %v1485_v6, %v1481_v9 }
 0x4c3   :  { %1492 = vst [vmem:[%s2216_s5] sm:$0xff] %v1487_v50 }
 0x4c4   :  { %1493 = vst [vmem:[%s2216_s5 + $0x8] sm:$0xff] %v1488_v44 }
 0x4c5   :  { %1494 = vst [vmem:[%s2216_s5 + $0x10] sm:$0xff] %v1489_v13 }
 0x4c6   :  { %1495 = vst [vmem:[%s2216_s5 + $0x18] sm:$0xff] %v1490_v14 }
 0x4c7   :  { %1496 = vst [vmem:[%s2216_s5 + $0x20] sm:$0xff] %v1491_v15 }

</bundles_post_ra>
